<compile_context>
chip_gen: v6e
topology: v6e:2x2x1
jax: 0.10.0
libtpu: 0.0.40
codegen_flags: <defaults>
</compile_context>

<pallas_src>
import functools

import numpy as np
import jax
import jax.numpy as jnp
from jax.experimental import pallas as pl
from jax.experimental.pallas import tpu as pltpu

LANE = 128
SUBLANE = 8


def _round_up(x, m):
    return (x + m - 1) // m * m


def _pick_tile(n_pad, maximum=512):
    for t in (512, 256, 128):
        if t <= maximum and n_pad % t == 0:
            return t
    return 128


def _plan_tiling(n):
    """Padded node count + (tm, tk) tile sizes for the tiled path."""
    n_pad = _round_up(max(n, LANE), LANE)
    if n_pad >= 1024:
        n_pad = _round_up(n, 512)
    tk = _pick_tile(n_pad)          # big tiles: ~85% of HBM roofline vs ~29% at 128
    tm = tk
    # v7x has 2 TensorCores: prefer >= 2 row tiles on the "parallel" axis.
    if n_pad // tm < 2 and n_pad >= 2 * LANE:
        tm_small = _pick_tile(n_pad, maximum=n_pad // 2)
        if n_pad % tm_small == 0 and n_pad // tm_small >= 2:
            tm = tm_small
    assert n_pad % tm == 0 and n_pad % tk == 0
    return n_pad, tm, tk


# --------------------------------------------------------------------------
# Fast path: whole model in one pallas_call (everything VMEM-resident).
# --------------------------------------------------------------------------
def _fused_small_kernel(a_ref, x_ref, w1_ref, s1_ref, t1_ref,
                        w2_ref, s2_ref, t2_ref,
                        w3_ref, s3_ref, t3_ref,
                        fcw_ref, fcb_ref, p_ref, out_ref):
    a = a_ref[...]                                            # (n, n) bf16

    def gcn(z_f32, s, t, res=None):
        agg = jnp.dot(a, z_f32.astype(jnp.bfloat16),
                      preferred_element_type=jnp.float32)
        h = agg * s + t                                       # folded bias + BN
        if res is not None:
            h = h + res
        return jnp.maximum(h, 0.0)

    z1 = jnp.dot(x_ref[...].astype(jnp.bfloat16), w1_ref[...],
                 preferred_element_type=jnp.float32)
    h1 = gcn(z1, s1_ref[...], t1_ref[...])
    z2 = jnp.dot(h1.astype(jnp.bfloat16), w2_ref[...],
                 preferred_element_type=jnp.float32)
    h2 = gcn(z2, s2_ref[...], t2_ref[...], res=h1)
    z3 = jnp.dot(h2.astype(jnp.bfloat16), w3_ref[...],
                 preferred_element_type=jnp.float32)
    h3 = gcn(z3, s3_ref[...], t3_ref[...])
    y = jnp.dot(h3.astype(jnp.bfloat16), fcw_ref[...],
                preferred_element_type=jnp.float32)           # (n, LANE)
    out_ref[...] = jnp.dot(p_ref[...], y,
                           preferred_element_type=jnp.float32) + fcb_ref[...]


def _forward_fused_small(a_hat, x, params, pool_mat):
    n = x.shape[0]
    g = pool_mat.shape[0]
    n_pad = _round_up(n, LANE)
    g_pad = _round_up(g, SUBLANE)
    in_pad = params["w1"].shape[0]

    a_p = jnp.pad(a_hat, ((0, n_pad - n), (0, n_pad - n))).astype(jnp.bfloat16)
    x_p = jnp.pad(x, ((0, n_pad - n), (0, in_pad - x.shape[1])))
    p_p = jnp.pad(pool_mat, ((0, g_pad - g), (0, n_pad - n)))

    inputs = (a_p, x_p,
              params["w1"], params["s1"], params["t1"],
              params["w2"], params["s2"], params["t2"],
              params["w3"], params["s3"], params["t3"],
              params["fc_w"], params["fc_b"], p_p)

    def full_spec(arr):
        nd = arr.ndim
        return pl.BlockSpec(arr.shape, lambda i, _nd=nd: (0,) * _nd)

    out = pl.pallas_call(
        _fused_small_kernel,
        out_shape=jax.ShapeDtypeStruct((g_pad, LANE), jnp.float32),
        grid_spec=pltpu.PrefetchScalarGridSpec(
            num_scalar_prefetch=0,
            grid=(1,),
            in_specs=[full_spec(v) for v in inputs],
            out_specs=pl.BlockSpec((g_pad, LANE), lambda i: (0, 0)),
        ),
        compiler_params=pltpu.CompilerParams(
            dimension_semantics=("arbitrary",),
            vmem_limit_bytes=int(48 << 20)),
    )(*inputs)
    return out[:g, 0]                                         # matches .squeeze()


# --------------------------------------------------------------------------
# Tiled path, kernel 1: layer-1 feature transform  Z1 = X @ W1
# --------------------------------------------------------------------------
def _transform_kernel(x_ref, w_ref, z_ref):
    z_ref[...] = jnp.dot(x_ref[...].astype(jnp.bfloat16), w_ref[...],
                         preferred_element_type=jnp.float32).astype(jnp.bfloat16)


def _feature_transform(x, w_bf16, *, tm):
    n, f_in = x.shape
    f_out = w_bf16.shape[1]
    return pl.pallas_call(
        _transform_kernel,
        out_shape=jax.ShapeDtypeStruct((n, f_out), jnp.bfloat16),
        grid_spec=pltpu.PrefetchScalarGridSpec(
            num_scalar_prefetch=0,
            grid=(n // tm,),
            in_specs=[pl.BlockSpec((tm, f_in), lambda i: (i, 0)),
                      pl.BlockSpec((f_in, f_out), lambda i: (0, 0))],
            out_specs=pl.BlockSpec((tm, f_out), lambda i: (i, 0)),
        ),
        compiler_params=pltpu.CompilerParams(
            dimension_semantics=("parallel",)),
    )(x, w_bf16)


# --------------------------------------------------------------------------
# Tiled path, kernel 2: block-sparse aggregation with fused epilogue.
#   h  = relu((A_hat @ Z) * s + t' [+ residual])          (f32, accumulated
#                                                           directly in h_ref)
#   zn = h.bf16 @ W_next  (next layer's transform, or fc projection for L3)
# grid = (row_tiles, max_nnz_col_blocks); Z fully resident; A tiles streamed
# only for nonzero column blocks (scalar-prefetched per-row block lists).
# --------------------------------------------------------------------------
def _aggregate_kernel(cols_ref, cnt_ref, *refs, has_residual, tk, max_k):
    if has_residual:
        a_ref, z_ref, s_ref, t_ref, res_ref, wn_ref, h_ref, zn_ref = refs
    else:
        a_ref, z_ref, s_ref, t_ref, wn_ref, h_ref, zn_ref = refs
        res_ref = None
    i = pl.program_id(0)
    k = pl.program_id(1)

    @pl.when(k == 0)
    def _():
        h_ref[...] = jnp.zeros_like(h_ref)

    @pl.when(k < cnt_ref[i])                      # skip all-zero A_hat blocks
    def _():
        kb = cols_ref[i * max_k + k]              # nonzero column-block index
        start = pl.multiple_of(kb * tk, tk)
        zk = z_ref[pl.ds(start, tk), :]           # slice of resident Z
        h_ref[...] += jnp.dot(a_ref[...], zk,
                              preferred_element_type=jnp.float32)

    @pl.when(k == pl.num_programs(1) - 1)
    def _():
        h = h_ref[...] * s_ref[...] + t_ref[...]  # folded bias + BN (f32)
        if res_ref is not None:
            h = h + res_ref[...]                  # residual
        h = jnp.maximum(h, 0.0)                   # relu
        h_ref[...] = h
        # Fused next-layer feature transform (or fc projection for layer 3).
        zn_ref[...] = jnp.dot(h.astype(jnp.bfloat16), wn_ref[...],
                              preferred_element_type=jnp.float32
                              ).astype(zn_ref.dtype)


def _gcn_aggregate(cols, cnt, a_bf16, z_bf16, scale, shift, residual, w_next,
                   zn_dtype, *, tm, tk):
    n_pad = a_bf16.shape[0]
    hdim = z_bf16.shape[1]
    nd = w_next.shape[1]
    n_row = n_pad // tm
    max_k = cols.shape[0] // n_row
    has_res = residual is not None

    def a_map(i, k, cols_ref, cnt_ref):
        return (i, cols_ref[i * max_k + k])

    in_specs = [
        pl.BlockSpec((tm, tk), a_map),                            # A_hat stream
        pl.BlockSpec((n_pad, hdim), lambda i, k, cb, ct: (0, 0)), # Z resident
        pl.BlockSpec((1, hdim), lambda i, k, cb, ct: (0, 0)),     # BN scale
        pl.BlockSpec((1, hdim), lambda i, k, cb, ct: (0, 0)),     # BN shift
    ]
    inputs = [a_bf16, z_bf16, scale, shift]
    if has_res:
        in_specs.append(pl.BlockSpec((tm, hdim), lambda i, k, cb, ct: (i, 0)))
        inputs.append(residual)
    in_specs.append(pl.BlockSpec((hdim, nd), lambda i, k, cb, ct: (0, 0)))
    inputs.append(w_next)

    zn_bytes = jnp.dtype(zn_dtype).itemsize
    vmem_est = (2 * tm * tk * 2                 # A tiles, bf16, double-buffered
                + 2 * n_pad * hdim * 2          # resident Z (counted x2, safe)
                + 2 * tm * hdim * 4             # resident h output tile
                + 2 * tm * nd * zn_bytes        # resident z_next output tile
                + (2 * tm * hdim * 4 if has_res else 0)
                + 2 * hdim * nd * 2             # W_next
                + 4 * hdim * 4)                 # scale / shift
    vmem_limit = int(min(max(vmem_est + (8 << 20), 24 << 20), 56 << 20))

    cost = pl.CostEstimate(
        flops=2 * n_pad * n_pad * hdim + 2 * n_pad * hdim * nd,
        transcendentals=0,
        bytes_accessed=(n_pad * n_pad * 2 + n_pad * hdim * 2
                        + n_pad * hdim * 4 + n_pad * nd * zn_bytes
                        + (n_pad * hdim * 4 if has_res else 0)),
    )

    kernel = functools.partial(_aggregate_kernel, has_residual=has_res,
                               tk=tk, max_k=max_k)
    h, zn = pl.pallas_call(
        kernel,
        out_shape=(jax.ShapeDtypeStruct((n_pad, hdim), jnp.float32),
                   jax.ShapeDtypeStruct((n_pad, nd), zn_dtype)),
        grid_spec=pltpu.PrefetchScalarGridSpec(
            num_scalar_prefetch=2,
            grid=(n_row, max_k),
            in_specs=in_specs,
            out_specs=[pl.BlockSpec((tm, hdim), lambda i, k, cb, ct: (i, 0)),
                       pl.BlockSpec((tm, nd), lambda i, k, cb, ct: (i, 0))],
        ),
        compiler_params=pltpu.CompilerParams(
            dimension_semantics=("parallel", "arbitrary"),
            vmem_limit_bytes=vmem_limit),
        cost_estimate=cost,
    )(cols, cnt, *inputs)
    return h, zn


def _forward_tiled(a_hat, x, params, pool_mat, block_cols, block_cnt):
    n = x.shape[0]
    n_pad, tm, tk = _plan_tiling(n)
    in_pad = params["w1"].shape[0]

    a_p = jnp.pad(a_hat, ((0, n_pad - n), (0, n_pad - n))).astype(jnp.bfloat16)
    x_p = jnp.pad(x, ((0, n_pad - n), (0, in_pad - x.shape[1])))

    if block_cols is None:                      # dense fallback pattern
        n_col = n_pad // tk
        block_cols = jnp.tile(jnp.arange(n_col, dtype=jnp.int32), n_pad // tm)
        block_cnt = jnp.full((n_pad // tm,), n_col, dtype=jnp.int32)

    # layer 1: standalone transform, then aggregation whose epilogue emits z2
    z1 = _feature_transform(x_p, params["w1"], tm=tm)
    h1, z2 = _gcn_aggregate(block_cols, block_cnt, a_p, z1,
                            params["s1"], params["t1"], None, params["w2"],
                            jnp.bfloat16, tm=tm, tk=tk)
    # dropout(0.2) -> identity in eval mode
    # layer 2 (+ residual); epilogue emits z3
    h2, z3 = _gcn_aggregate(block_cols, block_cnt, a_p, z2,
                            params["s2"], params["t2"], h1, params["w3"],
                            jnp.bfloat16, tm=tm, tk=tk)
    # layer 3; epilogue emits y = h3 @ fc_w (f32)
    _h3, y = _gcn_aggregate(block_cols, block_cnt, a_p, z3,
                            params["s3"], params["t3"], None, params["fc_w"],
                            jnp.float32, tm=tm, tk=tk)
    # readout collapses to a tiny pooled GEMV: out = P @ y[:, 0] + b  (XLA)
    return pool_mat @ y[:n, 0] + params["fc_b"][0, 0]


# --------------------------------------------------------------------------
# Top-level forward: fast fused path for small graphs, tiled path otherwise.
# --------------------------------------------------------------------------
def molecular_gcn_forward(a_hat, x, params, pool_mat,
                          block_cols=None, block_cnt=None, force_tiled=False):
    n = x.shape[0]
    small = _round_up(n, LANE) <= 1024          # whole problem fits in VMEM
    if small and not force_tiled:
        return _forward_fused_small(a_hat, x, params, pool_mat)
    return _forward_tiled(a_hat, x, params, pool_mat, block_cols, block_cnt)


# --------------------------------------------------------------------------
# Plain-JAX / numpy glue: graph preprocessing and parameter prep
# --------------------------------------------------------------------------
def build_normalized_adjacency(edge_index, num_nodes):
    """A_hat = D^{-1/2} (A + I) D^{-1/2}  (symmetric GCN normalization)."""
    src, dst = edge_index
    adj = jnp.zeros((num_nodes, num_nodes), jnp.float32)
    adj = adj.at[src, dst].set(1.0)
    adj = jnp.maximum(adj, adj.T)
    adj = adj + jnp.eye(num_nodes, dtype=jnp.float32)
    deg = jnp.sum(adj, axis=1)
    d_inv_sqrt = 1.0 / jnp.sqrt(deg)
    return adj * d_inv_sqrt[:, None] * d_inv_sqrt[None, :]


def build_pool_matrix(batch, num_graphs):
    """P[g, n] = 1 / count_g if batch[n] == g else 0  (global mean pool)."""
    onehot = (batch[None, :] == jnp.arange(num_graphs)[:, None]).astype(jnp.float32)
    counts = jnp.maximum(jnp.sum(onehot, axis=1, keepdims=True), 1.0)
    return onehot / counts


def build_block_pattern(a_hat_np, n_pad, tm, tk):
    """Host-side: per-row-tile nonzero column-block lists for block-sparse A_hat."""
    a_np = np.asarray(a_hat_np)
    n = a_np.shape[0]
    a_p = np.zeros((n_pad, n_pad), np.float32)
    a_p[:n, :n] = a_np
    n_row, n_col = n_pad // tm, n_pad // tk
    nz = np.abs(a_p.reshape(n_row, tm, n_col, tk)).sum(axis=(1, 3)) > 0
    cnt = nz.sum(axis=1).astype(np.int32)
    max_k = max(int(cnt.max()), 1)
    cols = np.zeros((n_row, max_k), np.int32)
    for i in range(n_row):
        idx = np.nonzero(nz[i])[0]
        if idx.size == 0:
            idx = np.array([0], dtype=np.int64)
        cols[i, :idx.size] = idx
        cols[i, idx.size:] = idx[-1]            # repeat last block -> no extra DMA
    return jnp.asarray(cols.reshape(-1)), jnp.asarray(cnt)


def init_raw_params(key, in_dim, hid_dim, out_dim):
    ks = jax.random.split(key, 10)

    def glorot(k, fan_in, fan_out):
        lim = jnp.sqrt(6.0 / (fan_in + fan_out))
        return jax.random.uniform(k, (fan_in, fan_out), jnp.float32, -lim, lim)

    def bn(k, dim):
        kg, kb = jax.random.split(k)
        return dict(gamma=1.0 + 0.1 * jax.random.normal(kg, (dim,), jnp.float32),
                    beta=0.1 * jax.random.normal(kb, (dim,), jnp.float32),
                    mean=jnp.zeros((dim,), jnp.float32),
                    var=jnp.ones((dim,), jnp.float32))

    fc_lim = 1.0 / jnp.sqrt(out_dim)
    return {
        "w1": glorot(ks[0], in_dim, hid_dim), "b1": jnp.zeros((hid_dim,), jnp.float32),
        "w2": glorot(ks[1], hid_dim, hid_dim), "b2": jnp.zeros((hid_dim,), jnp.float32),
        "w3": glorot(ks[2], hid_dim, out_dim), "b3": jnp.zeros((out_dim,), jnp.float32),
        "bn1": bn(ks[3], hid_dim), "bn2": bn(ks[4], hid_dim), "bn3": bn(ks[5], out_dim),
        "fc_w": jax.random.uniform(ks[6], (out_dim, 1), jnp.float32, -fc_lim, fc_lim),
        "fc_b": jax.random.uniform(ks[7], (1,), jnp.float32, -fc_lim, fc_lim),
    }


def fold_and_pad_params(raw, in_dim_pad, hid_pad, out_pad, eps=1e-5):
    """Fold conv bias into eval-mode BN (x*s + t'), pad feature dims to 128 lanes,
    and cast all MXU weight inputs to bf16."""
    def fold(bn, bias):
        s = bn["gamma"] / jnp.sqrt(bn["var"] + eps)
        t = bn["beta"] - bn["mean"] * s + bias * s
        return s, t

    def pad2(w, rows, cols):
        return jnp.pad(w, ((0, rows - w.shape[0]), (0, cols - w.shape[1])))

    def pad_row(v, cols):
        v = v.reshape(1, -1)
        return jnp.pad(v, ((0, 0), (0, cols - v.shape[1])))

    s1, t1 = fold(raw["bn1"], raw["b1"])
    s2, t2 = fold(raw["bn2"], raw["b2"])
    s3, t3 = fold(raw["bn3"], raw["b3"])
    return {
        "w1": pad2(raw["w1"], in_dim_pad, hid_pad).astype(jnp.bfloat16),
        "s1": pad_row(s1, hid_pad), "t1": pad_row(t1, hid_pad),
        "w2": pad2(raw["w2"], hid_pad, hid_pad).astype(jnp.bfloat16),
        "s2": pad_row(s2, hid_pad), "t2": pad_row(t2, hid_pad),
        "w3": pad2(raw["w3"], hid_pad, out_pad).astype(jnp.bfloat16),
        "s3": pad_row(s3, out_pad), "t3": pad_row(t3, out_pad),
        "fc_w": pad2(raw["fc_w"], out_pad, LANE).astype(jnp.bfloat16),
        "fc_b": pad2(raw["fc_b"].reshape(1, 1), 1, LANE),   # real value at [0, 0]
    }


def reference_forward(a_hat, x, raw, pool_mat, eps=1e-5):
    """Pure-JAX f32 reference (eval-mode BN, dropout = identity)."""
    def fold(bn, bias):
        s = bn["gamma"] / jnp.sqrt(bn["var"] + eps)
        return s, bn["beta"] - bn["mean"] * s + bias * s

    s1, t1 = fold(raw["bn1"], raw["b1"])
    s2, t2 = fold(raw["bn2"], raw["b2"])
    s3, t3 = fold(raw["bn3"], raw["b3"])
    h1 = jax.nn.relu((a_hat @ (x @ raw["w1"])) * s1 + t1)
    h2 = jax.nn.relu((a_hat @ (h1 @ raw["w2"])) * s2 + t2 + h1)
    h3 = jax.nn.relu((a_hat @ (h2 @ raw["w3"])) * s3 + t3)
    pooled = pool_mat @ h3
    return (pooled @ raw["fc_w"] + raw["fc_b"]).reshape(-1)


if __name__ == "__main__":
    key = jax.random.PRNGKey(0)
    k_feat, k_edge, k_par = jax.random.split(key, 3)

    # Small synthetic molecular batch: 8 graphs x 32 nodes each = 256 nodes.
    num_graphs, nodes_per_graph = 8, 32
    num_nodes = num_graphs * nodes_per_graph
    in_dim, hid_dim, out_dim = 16, 64, 64

    x = jax.random.normal(k_feat, (num_nodes, in_dim), jnp.float32)

    # Random edges kept inside each graph's node range.
    ks, kd = jax.random.split(k_edge)
    edges_per_graph = 16
    base = jnp.repeat(jnp.arange(num_graphs) * nodes_per_graph, edges_per_graph)
    src = base + jax.random.randint(ks, (num_graphs * edges_per_graph,), 0, nodes_per_graph)
    dst = base + jax.random.randint(kd, (num_graphs * edges_per_graph,), 0, nodes_per_graph)
    edge_index = jnp.stack([src, dst])
    batch = jnp.repeat(jnp.arange(num_graphs), nodes_per_graph)

    a_hat = build_normalized_adjacency(edge_index, num_nodes)
    pool_mat = build_pool_matrix(batch, num_graphs)

    raw = init_raw_params(k_par, in_dim, hid_dim, out_dim)
    params = fold_and_pad_params(
        raw,
        in_dim_pad=_round_up(in_dim, LANE),
        hid_pad=_round_up(hid_dim, LANE),
        out_pad=_round_up(out_dim, LANE),
    )

    # 1) Fast path: whole model fused into a single pallas_call.
    fwd_fast = jax.jit(molecular_gcn_forward)
    out_fast = fwd_fast(a_hat, x, params, pool_mat)
    jax.block_until_ready(out_fast)

    # 2) Tiled path with block-sparse (graph-block-diagonal) A_hat skipping.
    n_pad, tm, tk = _plan_tiling(num_nodes)
    cols, cnt = build_block_pattern(np.asarray(a_hat), n_pad, tm, tk)
    fwd_tiled = jax.jit(functools.partial(molecular_gcn_forward, force_tiled=True))
    out_tiled = fwd_tiled(a_hat, x, params, pool_mat, cols, cnt)
    jax.block_until_ready(out_tiled)

    # 3) Pure-JAX f32 reference (kernels use bf16 MXU inputs -> loose tolerance).
    ref = reference_forward(a_hat, x, raw, pool_mat)

    assert out_fast.shape == (num_graphs,)
    assert out_tiled.shape == (num_graphs,)
    assert bool(jnp.all(jnp.isfinite(out_fast)))
    assert bool(jnp.all(jnp.isfinite(out_tiled)))
    tol = 5e-2 + 5e-2 * float(jnp.max(jnp.abs(ref)))
    assert float(jnp.max(jnp.abs(out_fast - ref))) < tol, "fast path mismatch"
    assert float(jnp.max(jnp.abs(out_tiled - ref))) < tol, "tiled path mismatch"
    print("KERNEL_OK")
</pallas_src>

<mosaic_0001>
module attributes {stable_mosaic.version = 11 : i64} {
  func.func @_fused_small_kernel(%arg0: i32, %arg1: memref<256x256xbf16, #tpu.memory_space<vmem>>, %arg2: memref<256x128xf32, #tpu.memory_space<vmem>>, %arg3: memref<128x128xbf16, #tpu.memory_space<vmem>>, %arg4: memref<1x128xf32, #tpu.memory_space<vmem>>, %arg5: memref<1x128xf32, #tpu.memory_space<vmem>>, %arg6: memref<128x128xbf16, #tpu.memory_space<vmem>>, %arg7: memref<1x128xf32, #tpu.memory_space<vmem>>, %arg8: memref<1x128xf32, #tpu.memory_space<vmem>>, %arg9: memref<128x128xbf16, #tpu.memory_space<vmem>>, %arg10: memref<1x128xf32, #tpu.memory_space<vmem>>, %arg11: memref<1x128xf32, #tpu.memory_space<vmem>>, %arg12: memref<128x128xbf16, #tpu.memory_space<vmem>>, %arg13: memref<1x128xf32, #tpu.memory_space<vmem>>, %arg14: memref<8x256xf32, #tpu.memory_space<vmem>>, %arg15: memref<8x128xf32, #tpu.memory_space<vmem>>) attributes {dimension_semantics = [#tpu.dimension_semantics<arbitrary>], iteration_bounds = array<i64: 1>, scalar_prefetch = 0 : i64, scratch_operands = 0 : i64, tpu.core_type = #tpu.core_type<tc>, window_params = [{pipeline_mode = #tpu.pipeline_mode<synchronous>, transform_indices = @transform_0, window_bounds = array<i64: 256, 256>}, {pipeline_mode = #tpu.pipeline_mode<synchronous>, transform_indices = @transform_1, window_bounds = array<i64: 256, 128>}, {pipeline_mode = #tpu.pipeline_mode<synchronous>, transform_indices = @transform_2, window_bounds = array<i64: 128, 128>}, {pipeline_mode = #tpu.pipeline_mode<synchronous>, transform_indices = @transform_3, window_bounds = array<i64: 1, 128>}, {pipeline_mode = #tpu.pipeline_mode<synchronous>, transform_indices = @transform_4, window_bounds = array<i64: 1, 128>}, {pipeline_mode = #tpu.pipeline_mode<synchronous>, transform_indices = @transform_5, window_bounds = array<i64: 128, 128>}, {pipeline_mode = #tpu.pipeline_mode<synchronous>, transform_indices = @transform_6, window_bounds = array<i64: 1, 128>}, {pipeline_mode = #tpu.pipeline_mode<synchronous>, transform_indices = @transform_7, window_bounds = array<i64: 1, 128>}, {pipeline_mode = #tpu.pipeline_mode<synchronous>, transform_indices = @transform_8, window_bounds = array<i64: 128, 128>}, {pipeline_mode = #tpu.pipeline_mode<synchronous>, transform_indices = @transform_9, window_bounds = array<i64: 1, 128>}, {pipeline_mode = #tpu.pipeline_mode<synchronous>, transform_indices = @transform_10, window_bounds = array<i64: 1, 128>}, {pipeline_mode = #tpu.pipeline_mode<synchronous>, transform_indices = @transform_11, window_bounds = array<i64: 128, 128>}, {pipeline_mode = #tpu.pipeline_mode<synchronous>, transform_indices = @transform_12, window_bounds = array<i64: 1, 128>}, {pipeline_mode = #tpu.pipeline_mode<synchronous>, transform_indices = @transform_13, window_bounds = array<i64: 8, 256>}, {pipeline_mode = #tpu.pipeline_mode<synchronous>, transform_indices = @transform_14, window_bounds = array<i64: 8, 128>}]} {
    %c0 = arith.constant 0 : index
    %c0_0 = arith.constant 0 : index
    %0 = vector.load %arg1[%c0, %c0_0] : memref<256x256xbf16, #tpu.memory_space<vmem>>, vector<256x256xbf16>
    %c0_1 = arith.constant 0 : index
    %c0_2 = arith.constant 0 : index
    %1 = vector.load %arg2[%c0_1, %c0_2] : memref<256x128xf32, #tpu.memory_space<vmem>>, vector<256x128xf32>
    %2 = arith.truncf %1 : vector<256x128xf32> to vector<256x128xbf16>
    %c0_3 = arith.constant 0 : index
    %c0_4 = arith.constant 0 : index
    %3 = vector.load %arg3[%c0_3, %c0_4] : memref<128x128xbf16, #tpu.memory_space<vmem>>, vector<128x128xbf16>
    %cst = arith.constant dense<0.000000e+00> : vector<256x128xf32>
    %4 = tpu.matmul %2, %3, %cst {dimension_numbers = #tpu.dot_dimension_numbers<[1], [0], [0], [1], [0, 0, 1, 1], [], []>} : vector<256x128xbf16>, vector<128x128xbf16>, vector<256x128xf32> -> vector<256x128xf32>
    %c0_5 = arith.constant 0 : index
    %c0_6 = arith.constant 0 : index
    %5 = vector.load %arg4[%c0_5, %c0_6] : memref<1x128xf32, #tpu.memory_space<vmem>>, vector<1x128xf32>
    %c0_7 = arith.constant 0 : index
    %c0_8 = arith.constant 0 : index
    %6 = vector.load %arg5[%c0_7, %c0_8] : memref<1x128xf32, #tpu.memory_space<vmem>>, vector<1x128xf32>
    %7 = arith.truncf %4 : vector<256x128xf32> to vector<256x128xbf16>
    %cst_9 = arith.constant dense<0.000000e+00> : vector<256x128xf32>
    %8 = tpu.matmul %0, %7, %cst_9 {dimension_numbers = #tpu.dot_dimension_numbers<[1], [0], [0], [1], [0, 0, 1, 1], [], []>} : vector<256x256xbf16>, vector<256x128xbf16>, vector<256x128xf32> -> vector<256x128xf32>
    %9 = vector.broadcast %5 : vector<1x128xf32> to vector<256x128xf32>
    %10 = arith.mulf %8, %9 : vector<256x128xf32>
    %11 = vector.broadcast %6 : vector<1x128xf32> to vector<256x128xf32>
    %12 = arith.addf %10, %11 : vector<256x128xf32>
    %cst_10 = arith.constant 0.000000e+00 : f32
    %13 = vector.broadcast %cst_10 : f32 to vector<256x128xf32>
    %14 = arith.maximumf %12, %13 : vector<256x128xf32>
    %15 = arith.truncf %14 : vector<256x128xf32> to vector<256x128xbf16>
    %c0_11 = arith.constant 0 : index
    %c0_12 = arith.constant 0 : index
    %16 = vector.load %arg6[%c0_11, %c0_12] : memref<128x128xbf16, #tpu.memory_space<vmem>>, vector<128x128xbf16>
    %cst_13 = arith.constant dense<0.000000e+00> : vector<256x128xf32>
    %17 = tpu.matmul %15, %16, %cst_13 {dimension_numbers = #tpu.dot_dimension_numbers<[1], [0], [0], [1], [0, 0, 1, 1], [], []>} : vector<256x128xbf16>, vector<128x128xbf16>, vector<256x128xf32> -> vector<256x128xf32>
    %c0_14 = arith.constant 0 : index
    %c0_15 = arith.constant 0 : index
    %18 = vector.load %arg7[%c0_14, %c0_15] : memref<1x128xf32, #tpu.memory_space<vmem>>, vector<1x128xf32>
    %c0_16 = arith.constant 0 : index
    %c0_17 = arith.constant 0 : index
    %19 = vector.load %arg8[%c0_16, %c0_17] : memref<1x128xf32, #tpu.memory_space<vmem>>, vector<1x128xf32>
    %20 = arith.truncf %17 : vector<256x128xf32> to vector<256x128xbf16>
    %cst_18 = arith.constant dense<0.000000e+00> : vector<256x128xf32>
    %21 = tpu.matmul %0, %20, %cst_18 {dimension_numbers = #tpu.dot_dimension_numbers<[1], [0], [0], [1], [0, 0, 1, 1], [], []>} : vector<256x256xbf16>, vector<256x128xbf16>, vector<256x128xf32> -> vector<256x128xf32>
    %22 = vector.broadcast %18 : vector<1x128xf32> to vector<256x128xf32>
    %23 = arith.mulf %21, %22 : vector<256x128xf32>
    %24 = vector.broadcast %19 : vector<1x128xf32> to vector<256x128xf32>
    %25 = arith.addf %23, %24 : vector<256x128xf32>
    %26 = arith.addf %25, %14 : vector<256x128xf32>
    %cst_19 = arith.constant 0.000000e+00 : f32
    %27 = vector.broadcast %cst_19 : f32 to vector<256x128xf32>
    %28 = arith.maximumf %26, %27 : vector<256x128xf32>
    %29 = arith.truncf %28 : vector<256x128xf32> to vector<256x128xbf16>
    %c0_20 = arith.constant 0 : index
    %c0_21 = arith.constant 0 : index
    %30 = vector.load %arg9[%c0_20, %c0_21] : memref<128x128xbf16, #tpu.memory_space<vmem>>, vector<128x128xbf16>
    %cst_22 = arith.constant dense<0.000000e+00> : vector<256x128xf32>
    %31 = tpu.matmul %29, %30, %cst_22 {dimension_numbers = #tpu.dot_dimension_numbers<[1], [0], [0], [1], [0, 0, 1, 1], [], []>} : vector<256x128xbf16>, vector<128x128xbf16>, vector<256x128xf32> -> vector<256x128xf32>
    %c0_23 = arith.constant 0 : index
    %c0_24 = arith.constant 0 : index
    %32 = vector.load %arg10[%c0_23, %c0_24] : memref<1x128xf32, #tpu.memory_space<vmem>>, vector<1x128xf32>
    %c0_25 = arith.constant 0 : index
    %c0_26 = arith.constant 0 : index
    %33 = vector.load %arg11[%c0_25, %c0_26] : memref<1x128xf32, #tpu.memory_space<vmem>>, vector<1x128xf32>
    %34 = arith.truncf %31 : vector<256x128xf32> to vector<256x128xbf16>
    %cst_27 = arith.constant dense<0.000000e+00> : vector<256x128xf32>
    %35 = tpu.matmul %0, %34, %cst_27 {dimension_numbers = #tpu.dot_dimension_numbers<[1], [0], [0], [1], [0, 0, 1, 1], [], []>} : vector<256x256xbf16>, vector<256x128xbf16>, vector<256x128xf32> -> vector<256x128xf32>
    %36 = vector.broadcast %32 : vector<1x128xf32> to vector<256x128xf32>
    %37 = arith.mulf %35, %36 : vector<256x128xf32>
    %38 = vector.broadcast %33 : vector<1x128xf32> to vector<256x128xf32>
    %39 = arith.addf %37, %38 : vector<256x128xf32>
    %cst_28 = arith.constant 0.000000e+00 : f32
    %40 = vector.broadcast %cst_28 : f32 to vector<256x128xf32>
    %41 = arith.maximumf %39, %40 : vector<256x128xf32>
    %42 = arith.truncf %41 : vector<256x128xf32> to vector<256x128xbf16>
    %c0_29 = arith.constant 0 : index
    %c0_30 = arith.constant 0 : index
    %43 = vector.load %arg12[%c0_29, %c0_30] : memref<128x128xbf16, #tpu.memory_space<vmem>>, vector<128x128xbf16>
    %cst_31 = arith.constant dense<0.000000e+00> : vector<256x128xf32>
    %44 = tpu.matmul %42, %43, %cst_31 {dimension_numbers = #tpu.dot_dimension_numbers<[1], [0], [0], [1], [0, 0, 1, 1], [], []>} : vector<256x128xbf16>, vector<128x128xbf16>, vector<256x128xf32> -> vector<256x128xf32>
    %c0_32 = arith.constant 0 : index
    %c0_33 = arith.constant 0 : index
    %45 = vector.load %arg14[%c0_32, %c0_33] : memref<8x256xf32, #tpu.memory_space<vmem>>, vector<8x256xf32>
    %cst_34 = arith.constant dense<0.000000e+00> : vector<8x128xf32>
    %46 = tpu.matmul %45, %44, %cst_34 {dimension_numbers = #tpu.dot_dimension_numbers<[1], [0], [0], [1], [0, 0, 1, 1], [], []>} : vector<8x256xf32>, vector<256x128xf32>, vector<8x128xf32> -> vector<8x128xf32>
    %c0_35 = arith.constant 0 : index
    %c0_36 = arith.constant 0 : index
    %47 = vector.load %arg13[%c0_35, %c0_36] : memref<1x128xf32, #tpu.memory_space<vmem>>, vector<1x128xf32>
    %48 = vector.broadcast %47 : vector<1x128xf32> to vector<8x128xf32>
    %49 = arith.addf %46, %48 : vector<8x128xf32>
    %c0_37 = arith.constant 0 : index
    %c0_38 = arith.constant 0 : index
    %50 = vector.load %arg15[%c0_37, %c0_38] : memref<8x128xf32, #tpu.memory_space<vmem>>, vector<8x128xf32>
    tpu.vector_store %arg15[%c0_37, %c0_38], %49 {strides = array<i32>} : memref<8x128xf32, #tpu.memory_space<vmem>>, vector<8x128xf32>,
    return
  }
  func.func @transform_0(%arg0: i32) -> (i32, i32) {
    %c0_i32 = arith.constant 0 : i32
    %c0_i32_0 = arith.constant 0 : i32
    %c0_i32_1 = arith.constant 0 : i32
    return %c0_i32, %c0_i32_0 : i32, i32
  }
  func.func @transform_1(%arg0: i32) -> (i32, i32) {
    %c0_i32 = arith.constant 0 : i32
    %c0_i32_0 = arith.constant 0 : i32
    %c0_i32_1 = arith.constant 0 : i32
    return %c0_i32, %c0_i32_0 : i32, i32
  }
  func.func @transform_2(%arg0: i32) -> (i32, i32) {
    %c0_i32 = arith.constant 0 : i32
    %c0_i32_0 = arith.constant 0 : i32
    %c0_i32_1 = arith.constant 0 : i32
    return %c0_i32, %c0_i32_0 : i32, i32
  }
  func.func @transform_3(%arg0: i32) -> (i32, i32) {
    %c0_i32 = arith.constant 0 : i32
    %c0_i32_0 = arith.constant 0 : i32
    %c0_i32_1 = arith.constant 0 : i32
    return %c0_i32, %c0_i32_0 : i32, i32
  }
  func.func @transform_4(%arg0: i32) -> (i32, i32) {
    %c0_i32 = arith.constant 0 : i32
    %c0_i32_0 = arith.constant 0 : i32
    %c0_i32_1 = arith.constant 0 : i32
    return %c0_i32, %c0_i32_0 : i32, i32
  }
  func.func @transform_5(%arg0: i32) -> (i32, i32) {
    %c0_i32 = arith.constant 0 : i32
    %c0_i32_0 = arith.constant 0 : i32
    %c0_i32_1 = arith.constant 0 : i32
    return %c0_i32, %c0_i32_0 : i32, i32
  }
  func.func @transform_6(%arg0: i32) -> (i32, i32) {
    %c0_i32 = arith.constant 0 : i32
    %c0_i32_0 = arith.constant 0 : i32
    %c0_i32_1 = arith.constant 0 : i32
    return %c0_i32, %c0_i32_0 : i32, i32
  }
  func.func @transform_7(%arg0: i32) -> (i32, i32) {
    %c0_i32 = arith.constant 0 : i32
    %c0_i32_0 = arith.constant 0 : i32
    %c0_i32_1 = arith.constant 0 : i32
    return %c0_i32, %c0_i32_0 : i32, i32
  }
  func.func @transform_8(%arg0: i32) -> (i32, i32) {
    %c0_i32 = arith.constant 0 : i32
    %c0_i32_0 = arith.constant 0 : i32
    %c0_i32_1 = arith.constant 0 : i32
    return %c0_i32, %c0_i32_0 : i32, i32
  }
  func.func @transform_9(%arg0: i32) -> (i32, i32) {
    %c0_i32 = arith.constant 0 : i32
    %c0_i32_0 = arith.constant 0 : i32
    %c0_i32_1 = arith.constant 0 : i32
    return %c0_i32, %c0_i32_0 : i32, i32
  }
  func.func @transform_10(%arg0: i32) -> (i32, i32) {
    %c0_i32 = arith.constant 0 : i32
    %c0_i32_0 = arith.constant 0 : i32
    %c0_i32_1 = arith.constant 0 : i32
    return %c0_i32, %c0_i32_0 : i32, i32
  }
  func.func @transform_11(%arg0: i32) -> (i32, i32) {
    %c0_i32 = arith.constant 0 : i32
    %c0_i32_0 = arith.constant 0 : i32
    %c0_i32_1 = arith.constant 0 : i32
    return %c0_i32, %c0_i32_0 : i32, i32
  }
  func.func @transform_12(%arg0: i32) -> (i32, i32) {
    %c0_i32 = arith.constant 0 : i32
    %c0_i32_0 = arith.constant 0 : i32
    %c0_i32_1 = arith.constant 0 : i32
    return %c0_i32, %c0_i32_0 : i32, i32
  }
  func.func @transform_13(%arg0: i32) -> (i32, i32) {
    %c0_i32 = arith.constant 0 : i32
    %c0_i32_0 = arith.constant 0 : i32
    %c0_i32_1 = arith.constant 0 : i32
    return %c0_i32, %c0_i32_0 : i32, i32
  }
  func.func @transform_14(%arg0: i32) -> (i32, i32) {
    %c0_i32 = arith.constant 0 : i32
    %c0_i32_0 = arith.constant 0 : i32
    %c0_i32_1 = arith.constant 0 : i32
    return %c0_i32, %c0_i32_0 : i32, i32
  }
}

</mosaic_0001>

<bundles_post_ra>
// kernel: molecular_gcn_forward.1
= control target key start
LH: loop header
LB: loop body
LE: loop exit
PB: predicated region body
PF: predicated region fallthrough
CT: control target
= control target key end

     0   :  { %s4121_s2 = inlined_call_operand.vmem [shape: bf16[128,128], index: 2, kind: input, shape index: {}]   ;;  %s4122_s1 = inlined_call_operand.vmem [shape: f32[256,128], index: 1, kind: input, shape index: {}]   ;;  %s4123_s0 = inlined_call_operand.vmem [shape: bf16[256,256], index: 0, kind: input, shape index: {}]   ;;  %s4124_s5 = inlined_call_operand.vmem [shape: bf16[128,128], index: 5, kind: input, shape index: {}]   ;;  %s4125_s3 = inlined_call_operand.vmem [shape: f32[1,128], index: 3, kind: input, shape index: {}]   ;;  %s4126_s4 = inlined_call_operand.vmem [shape: f32[1,128], index: 4, kind: input, shape index: {}]   ;;  %s4127_s8 = inlined_call_operand.vmem [shape: bf16[128,128], index: 8, kind: input, shape index: {}]   ;;  %s4128_s6 = inlined_call_operand.vmem [shape: f32[1,128], index: 6, kind: input, shape index: {}]   ;;  %s4129_s7 = inlined_call_operand.vmem [shape: f32[1,128], index: 7, kind: input, shape index: {}]   ;;  %s4130_s11 = inlined_call_operand.vmem [shape: bf16[128,128], index: 11, kind: input, shape index: {}]   ;;  %s4131_s9 = inlined_call_operand.vmem [shape: f32[1,128], index: 9, kind: input, shape index: {}]   ;;  %s4132_s10 = inlined_call_operand.vmem [shape: f32[1,128], index: 10, kind: input, shape index: {}]   ;;  %s4133_s13 = inlined_call_operand.vmem [shape: f32[8,256], index: 13, kind: input, shape index: {}]   ;;  %s4134_s12 = inlined_call_operand.vmem [shape: f32[1,128], index: 12, kind: input, shape index: {}]   ;;  %s4135_s14 = inlined_call_operand.vmem [shape: f32[8,128], index: 14, kind: output, shape index: {}]  }
   0x1   :  { %v2943_v0 = vld [vmem:[%s4121_s2 + $0x38] sm:$0xff]   ;;  %v2944_v1 = vld [vmem:[%s4121_s2 + $0x30] sm:$0xff]   ;;  %v2945_v2 = vld [vmem:[%s4121_s2 + $0x28] sm:$0xff]  }
   0x2   :  { %2751 = vmatprep.subr.bf16.mxu0 %v2943_v0  ;;  %v2946_v3 = vld [vmem:[%s4121_s2 + $0x20] sm:$0xff]   ;;  %v81_v5 = vld [vmem:[%s4122_s1 + $0x8] sm:$0xff]  ;;  %v2947_v7 = vld [vmem:[%s4121_s2 + $0x18] sm:$0xff]  }
   0x3   :  { %2752 = vmatpush3.bf16.msra.mxu0 %v2943_v0  ;;  %v80_v4 = vld [vmem:[%s4122_s1] sm:$0xff]  ;;  %v2948_v8 = vld [vmem:[%s4121_s2 + $0x10] sm:$0xff]   ;;  %v2949_v9 = vld [vmem:[%s4121_s2 + $0x8] sm:$0xff]  }
   0x4   :  { %2753 = vmatprep.subr.bf16.mxu0 %v2944_v1  ;;  %v112_v6 = vpack.c.bf16 %v81_v5, %v80_v4  ;;  %v2950_v10 = vld [vmem:[%s4121_s2] sm:$0xff]   ;;  %v82_v11 = vld [vmem:[%s4122_s1 + $0x10] sm:$0xff]  ;;  %v83_v12 = vld [vmem:[%s4122_s1 + $0x18] sm:$0xff] }
   0x5   :  { %v84_v13 = vld [vmem:[%s4122_s1 + $0x20] sm:$0xff]  ;;  %v85_v14 = vld [vmem:[%s4122_s1 + $0x28] sm:$0xff]  ;;  %v113_v15 = vpack.c.bf16 %v83_v12, %v82_v11  ;;  %v86_v17 = vld [vmem:[%s4122_s1 + $0x30] sm:$0xff] }
   0x6   :  { %2767 = vmatprep.mubr.bf16.mxu0 %v112_v6  ;;  %v114_v16 = vpack.c.bf16 %v85_v14, %v84_v13  ;;  %v87_v18 = vld [vmem:[%s4122_s1 + $0x38] sm:$0xff]  ;;  %v88_v19 = vld [vmem:[%s4122_s1 + $0x40] sm:$0xff]  ;;  %v89_v20 = vld [vmem:[%s4122_s1 + $0x48] sm:$0xff] }
   0x7   :  { %2754 = vmatpush3.bf16.msra.mxu0 %v2944_v1  ;;  %v115_v21 = vpack.c.bf16 %v87_v18, %v86_v17  ;;  %v116_v22 = vpack.c.bf16 %v89_v20, %v88_v19  ;;  %v90_v23 = vld [vmem:[%s4122_s1 + $0x50] sm:$0xff]  ;;  %v91_v24 = vld [vmem:[%s4122_s1 + $0x58] sm:$0xff]  ;;  %v92_v25 = vld [vmem:[%s4122_s1 + $0x60] sm:$0xff] }
   0x8   :  { %2755 = vmatprep.subr.bf16.mxu0 %v2945_v2  ;;  %v93_v26 = vld [vmem:[%s4122_s1 + $0x68] sm:$0xff]  ;;  %v117_v27 = vpack.c.bf16 %v91_v24, %v90_v23  ;;  %v94_v29 = vld [vmem:[%s4122_s1 + $0x70] sm:$0xff]  ;;  %v95_v30 = vld [vmem:[%s4122_s1 + $0x78] sm:$0xff] }
   0x9   :  { %v118_v28 = vpack.c.bf16 %v93_v26, %v92_v25  ;;  %v96_v31 = vld [vmem:[%s4122_s1 + $0x80] sm:$0xff]  ;;  %v97_v32 = vld [vmem:[%s4122_s1 + $0x88] sm:$0xff]  ;;  %v119_v33 = vpack.c.bf16 %v95_v30, %v94_v29  ;;  %v98_v35 = vld [vmem:[%s4122_s1 + $0x90] sm:$0xff] }
   0xa   :  { %v120_v34 = vpack.c.bf16 %v97_v32, %v96_v31  ;;  %v99_v36 = vld [vmem:[%s4122_s1 + $0x98] sm:$0xff]  ;;  %v100_v37 = vld [vmem:[%s4122_s1 + $0xa0] sm:$0xff]  ;;  %v101_v38 = vld [vmem:[%s4122_s1 + $0xa8] sm:$0xff] }
   0xb   :  { %2756 = vmatpush3.bf16.msra.mxu0 %v2945_v2  ;;  %v121_v39 = vpack.c.bf16 %v99_v36, %v98_v35  ;;  %v122_v40 = vpack.c.bf16 %v101_v38, %v100_v37  ;;  %v102_v41 = vld [vmem:[%s4122_s1 + $0xb0] sm:$0xff]  ;;  %v103_v42 = vld [vmem:[%s4122_s1 + $0xb8] sm:$0xff]  ;;  %v104_v43 = vld [vmem:[%s4122_s1 + $0xc0] sm:$0xff] }
   0xc   :  { %2757 = vmatprep.subr.bf16.mxu0 %v2946_v3  ;;  %v105_v44 = vld [vmem:[%s4122_s1 + $0xc8] sm:$0xff]  ;;  %v123_v45 = vpack.c.bf16 %v103_v42, %v102_v41  ;;  %v106_v47 = vld [vmem:[%s4122_s1 + $0xd0] sm:$0xff]  ;;  %v107_v48 = vld [vmem:[%s4122_s1 + $0xd8] sm:$0xff] }
   0xd   :  { %v124_v46 = vpack.c.bf16 %v105_v44, %v104_v43  ;;  %v108_v49 = vld [vmem:[%s4122_s1 + $0xe0] sm:$0xff]  ;;  %v109_v50 = vld [vmem:[%s4122_s1 + $0xe8] sm:$0xff]  ;;  %v125_v51 = vpack.c.bf16 %v107_v48, %v106_v47  ;;  %v110_v53 = vld [vmem:[%s4122_s1 + $0xf0] sm:$0xff] }
   0xe   :  { %v126_v52 = vpack.c.bf16 %v109_v50, %v108_v49  ;;  %v111_v54 = vld [vmem:[%s4122_s1 + $0xf8] sm:$0xff]  ;;  %v3253_v56 = vld [vmem:[%s4123_s0 + $0x4] ss:$8 sps:$4 sm:$0xff]   ;;  %v3266_v41 = vld [vmem:[%s4123_s0] ss:$8 sps:$4 sm:$0xff]  }
   0xf   :  { %2758 = vmatpush3.bf16.msra.mxu0 %v2946_v3  ;;  %v127_v55 = vpack.c.bf16 %v111_v54, %v110_v53  ;;  %563 = vmatprep.mubr.bf16.mxu1 %v3253_v56  ;;  %v3000_v42 = vld [vmem:[%s4124_s5 + $0x30] sm:$0xff]   ;;  %v3295_v47 = vld [vmem:[%s4123_s0 + $0x20] ss:$8 sps:$4 sm:$0xff]   ;;  %v3312_v50 = vld [vmem:[%s4123_s0 + $0x44] ss:$8 sps:$4 sm:$0xff]  }
  0x10   :  { %2759 = vmatprep.subr.bf16.mxu0 %v2947_v7  ;;  %v3276_v44 = vld [vmem:[%s4123_s0 + $0x14] ss:$8 sps:$4 sm:$0xff]   ;;  %v3307_v49 = vld [vmem:[%s4123_s0 + $0x30] ss:$8 sps:$4 sm:$0xff]   ;;  %v3336_v54 = vld [vmem:[%s4123_s0 + $0x64] ss:$8 sps:$4 sm:$0xff]  }
  0x11   :  { %v3300_v48 = vld [vmem:[%s4123_s0 + $0x34] ss:$8 sps:$4 sm:$0xff]   ;;  %v3331_v53 = vld [vmem:[%s4123_s0 + $0x50] ss:$8 sps:$4 sm:$0xff]  }
  0x13   :  { %2760 = vmatpush3.bf16.msra.mxu0 %v2947_v7 }
  0x14   :  { %2761 = vmatprep.subr.bf16.mxu0 %v2948_v8 }
  0x17   :  { %2762 = vmatpush3.bf16.msra.mxu0 %v2948_v8 }
  0x18   :  { %2763 = vmatprep.subr.bf16.mxu0 %v2949_v9 }
  0x1b   :  { %2764 = vmatpush3.bf16.msra.mxu0 %v2949_v9 }
  0x1c   :  { %2765 = vmatprep.subr.bf16.mxu0 %v2950_v10 }
  0x1f   :  { %2766 = vmatpush3.bf16.msra.mxu0 %v2950_v10 }
  0x22   :  { %2768 = vmatmul.mubr.bf16.vlgmr.msra.gmra.mxu0 %v113_v15 }
  0x23   :  { %2771 = vmatprep.mubr.bf16.mxu0 %v114_v16 }
  0x2a   :  { %2772 = vmatmul.mubr.bf16.gmra.mxu0 %v115_v21 }
  0x2b   :  { %2775 = vmatprep.mubr.bf16.mxu0 %v116_v22 }
  0x32   :  { %2776 = vmatmul.mubr.bf16.gmra.mxu0 %v117_v27 }
  0x33   :  { %2779 = vmatprep.mubr.bf16.mxu0 %v118_v28 }
  0x3a   :  { %2780 = vmatmul.mubr.bf16.gmra.mxu0 %v119_v33 }
  0x3b   :  { %2783 = vmatprep.mubr.bf16.mxu0 %v120_v34 }
  0x42   :  { %2784 = vmatmul.mubr.bf16.gmra.mxu0 %v121_v39 }
  0x43   :  { %2787 = vmatprep.mubr.bf16.mxu0 %v122_v40  ;;  %v2999_v40 = vld [vmem:[%s4124_s5 + $0x38] sm:$0xff]  }
  0x44   :  { %2799 = vmatprep.subr.bf16.mxu0 %v2999_v40 }
  0x45   :  { %2800 = vmatpush3.bf16.msra.mxu0 %v2999_v40 }
  0x46   :  { %2801 = vmatprep.subr.bf16.mxu0 %v3000_v42 }
  0x49   :  { %2802 = vmatpush3.bf16.msra.mxu0 %v3000_v42 }
  0x4a   :  { %2788 = vmatmul.mubr.bf16.gmra.mxu0 %v123_v45  ;;  %v3283_v45 = vld [vmem:[%s4123_s0 + $0x10] ss:$8 sps:$4 sm:$0xff]  }
  0x4b   :  { %2791 = vmatprep.mubr.bf16.mxu0 %v124_v46  ;;  %v3288_v46 = vld [vmem:[%s4123_s0 + $0x24] ss:$8 sps:$4 sm:$0xff]  }
  0x52   :  { %2792 = vmatmul.mubr.bf16.gmra.mxu0 %v125_v51  ;;  %v3319_v51 = vld [vmem:[%s4123_s0 + $0x40] ss:$8 sps:$4 sm:$0xff]  }
  0x53   :  { %2795 = vmatprep.mubr.bf16.mxu0 %v126_v52  ;;  %v3324_v52 = vld [vmem:[%s4123_s0 + $0x54] ss:$8 sps:$4 sm:$0xff]  }
  0x5a   :  { %2796 = vmatmul.mubr.bf16.gmra.mxu0 %v127_v55  ;;  %v3343_v55 = vld [vmem:[%s4123_s0 + $0x60] ss:$8 sps:$4 sm:$0xff]  }
  0xe2   :  { %v2769_v57 = vpop.f32.mrf.mxu0 }
  0xe4   :  { %v3256_v58 = vpop.f32.mrf.mxu0 }
  0xe6   :  { %v2770_v59 = vpop.f32.mrf.mxu0 }
  0xe7   :  { %v356_v60 = vpack.c.bf16 %v2770_v59, %v2769_v57  ;;  %v3348_v57 = vld [vmem:[%s4123_s0 + $0x74] ss:$8 sps:$4 sm:$0xff]   ;;  %v3360_v59 = vld [vmem:[%s4123_s0 + $0x84] ss:$8 sps:$4 sm:$0xff]  }
  0xe8   :  { %v3258_v61 = vpop.f32.mrf.mxu0 }
  0xe9   :  { %v355_v43 = vpack.c.bf16 %v3258_v61, %v3256_v58  ;;  %v3355_v58 = vld [vmem:[%s4123_s0 + $0x70] ss:$8 sps:$4 sm:$0xff]   ;;  %v3372_v61 = vld [vmem:[%s4123_s0 + $0x94] ss:$8 sps:$4 sm:$0xff]  }
  0xea   :  { %v2773_v62 = vpop.f32.mrf.mxu0 }
  0xec   :  { %v242_v63 = vpop.f32.mrf.mxu0 }
  0xee   :  { %v2774_v0 = vpop.f32.mrf.mxu0 }
  0xef   :  { %v358_v1 = vpack.c.bf16 %v2774_v0, %v2773_v62  ;;  %v3001_v62 = vld [vmem:[%s4124_s5 + $0x28] sm:$0xff]   ;;  %v3385_v0 = vld [vmem:[%s4123_s0 + $0x90] ss:$8 sps:$4 sm:$0xff]  }
  0xf0   :  { %v245_v2 = vpop.f32.mrf.mxu0  ;;  %2803 = vmatprep.subr.bf16.mxu0 %v3001_v62 }
  0xf1   :  { %v357_v37 = vpack.c.bf16 %v245_v2, %v242_v63  ;;  %2804 = vmatpush3.bf16.msra.mxu0 %v3001_v62  ;;  %v3002_v63 = vld [vmem:[%s4124_s5 + $0x20] sm:$0xff]   ;;  %v3003_v2 = vld [vmem:[%s4124_s5 + $0x18] sm:$0xff]  }
  0xf2   :  { %v2777_v3 = vpop.f32.mrf.mxu0  ;;  %2805 = vmatprep.subr.bf16.mxu0 %v3002_v63 }
  0xf4   :  { %v258_v4 = vpop.f32.mrf.mxu0 }
  0xf5   :  { %2806 = vmatpush3.bf16.msra.mxu0 %v3002_v63 }
  0xf6   :  { %v2778_v5 = vpop.f32.mrf.mxu0  ;;  %2807 = vmatprep.subr.bf16.mxu0 %v3003_v2 }
  0xf7   :  { %v360_v32 = vpack.c.bf16 %v2778_v5, %v2777_v3  ;;  %v3004_v3 = vld [vmem:[%s4124_s5 + $0x10] sm:$0xff]  }
  0xf8   :  { %v261_v6 = vpop.f32.mrf.mxu0  ;;  %v3408_v5 = vld [vmem:[%s4123_s0 + $0xb4] ss:$8 sps:$4 sm:$0xff]  }
  0xf9   :  { %v359_v34 = vpack.c.bf16 %v261_v6, %v258_v4  ;;  %2808 = vmatpush3.bf16.msra.mxu0 %v3003_v2  ;;  %v3403_v4 = vld [vmem:[%s4123_s0 + $0xa0] ss:$8 sps:$4 sm:$0xff]  }
  0xfa   :  { %v2781_v7 = vpop.f32.mrf.mxu0  ;;  %2809 = vmatprep.subr.bf16.mxu0 %v3004_v3  ;;  %v3005_v6 = vld [vmem:[%s4124_s5 + $0x8] sm:$0xff]  }
  0xfc   :  { %v274_v8 = vpop.f32.mrf.mxu0 }
  0xfd   :  { %2810 = vmatpush3.bf16.msra.mxu0 %v3004_v3 }
  0xfe   :  { %v2782_v9 = vpop.f32.mrf.mxu0  ;;  %2811 = vmatprep.subr.bf16.mxu0 %v3005_v6 }
  0xff   :  { %v362_v27 = vpack.c.bf16 %v2782_v9, %v2781_v7  ;;  %v3006_v7 = vld [vmem:[%s4124_s5] sm:$0xff]  }
 0x100   :  { %v277_v10 = vpop.f32.mrf.mxu0  ;;  %v3426_v9 = vld [vmem:[%s4123_s0 + $0xc4] ss:$8 sps:$4 sm:$0xff]  }
 0x101   :  { %v361_v30 = vpack.c.bf16 %v277_v10, %v274_v8  ;;  %2812 = vmatpush3.bf16.msra.mxu0 %v3005_v6  ;;  %v3421_v8 = vld [vmem:[%s4123_s0 + $0xb0] ss:$8 sps:$4 sm:$0xff]   ;;  %v3433_v10 = vld [vmem:[%s4123_s0 + $0xc0] ss:$8 sps:$4 sm:$0xff]  }
 0x102   :  { %v2785_v11 = vpop.f32.mrf.mxu0  ;;  %2813 = vmatprep.subr.bf16.mxu0 %v3006_v7  ;;  %4207 = vst [vmem:[#allocation2_spill] sm:$0xff] %v3433_v10 }
 0x104   :  { %v290_v12 = vpop.f32.mrf.mxu0 }
 0x105   :  { %2814 = vmatpush3.bf16.msra.mxu0 %v3006_v7 }
 0x106   :  { %v2786_v13 = vpop.f32.mrf.mxu0 }
 0x107   :  { %v364_v38 = vpack.c.bf16 %v2786_v13, %v2785_v11  ;;  %v3438_v11 = vld [vmem:[%s4123_s0 + $0xd4] ss:$8 sps:$4 sm:$0xff]   ;;  %v3450_v13 = vld [vmem:[%s4123_s0 + $0xe4] ss:$8 sps:$4 sm:$0xff]  }
 0x108   :  { %v293_v14 = vpop.f32.mrf.mxu0  ;;  %4208 = vst [vmem:[#allocation3_spill] sm:$0xff] %v3438_v11  ;;  %4210 = vst [vmem:[#allocation5_spill] sm:$0xff] %v3450_v13 }
 0x109   :  { %v363_v39 = vpack.c.bf16 %v293_v14, %v290_v12  ;;  %v3445_v12 = vld [vmem:[%s4123_s0 + $0xd0] ss:$8 sps:$4 sm:$0xff]   ;;  %v3457_v14 = vld [vmem:[%s4123_s0 + $0xe0] ss:$8 sps:$4 sm:$0xff]  }
 0x10a   :  { %v2789_v15 = vpop.f32.mrf.mxu0  ;;  %4209 = vst [vmem:[#allocation4_spill] sm:$0xff] %v3445_v12  ;;  %4211 = vst [vmem:[#allocation6_spill] sm:$0xff] %v3457_v14 }
 0x10c   :  { %v306_v16 = vpop.f32.mrf.mxu0 }
 0x10e   :  { %v2790_v17 = vpop.f32.mrf.mxu0 }
 0x10f   :  { %v366_v35 = vpack.c.bf16 %v2790_v17, %v2789_v15  ;;  %v3462_v15 = vld [vmem:[%s4123_s0 + $0xf4] ss:$8 sps:$4 sm:$0xff]  }
 0x110   :  { %v309_v18 = vpop.f32.mrf.mxu0  ;;  %4212 = vst [vmem:[#allocation7_spill] sm:$0xff] %v3462_v15 }
 0x111   :  { %v365_v36 = vpack.c.bf16 %v309_v18, %v306_v16  ;;  %v3469_v16 = vld [vmem:[%s4123_s0 + $0xf0] ss:$8 sps:$4 sm:$0xff]   ;;  %v3475_v18 = vld [vmem:[%s4125_s3] ss:$0 sm:$0xff] }
 0x112   :  { %v2793_v19 = vpop.f32.mrf.mxu0  ;;  %4213 = vst [vmem:[#allocation8_spill] sm:$0xff] %v3469_v16 }
 0x114   :  { %v322_v20 = vpop.f32.mrf.mxu0 }
 0x116   :  { %v2794_v21 = vpop.f32.mrf.mxu0 }
 0x117   :  { %v368_v31 = vpack.c.bf16 %v2794_v21, %v2793_v19 }
 0x118   :  { %v325_v22 = vpop.f32.mrf.mxu0 }
 0x119   :  { %v367_v33 = vpack.c.bf16 %v325_v22, %v322_v20 }
 0x11a   :  { %v2797_v23 = vpop.f32.mrf.mxu0 }
 0x11c   :  { %v338_v24 = vpop.f32.mrf.mxu0 }
 0x11e   :  { %v2798_v25 = vpop.f32.mrf.mxu0 }
 0x11f   :  { %v370_v26 = vpack.c.bf16 %v2798_v25, %v2797_v23  ;;  %v3481_v23 = vld [vmem:[%s4126_s4] ss:$0 sm:$0xff] }
 0x120   :  { %v341_v28 = vpop.f32.mrf.mxu0 }
 0x121   :  { %v369_v29 = vpack.c.bf16 %v341_v28, %v338_v24  ;;  %2308 = vmatprep.subr.bf16.mxu1 %v370_v26 }
 0x122   :  { %2309 = vmatpush3.bf16.msra.mxu1 %v362_v27 }
 0x123   :  { %2310 = vmatprep.subr.bf16.mxu1 %v369_v29 }
 0x126   :  { %2311 = vmatpush3.bf16.msra.mxu1 %v361_v30 }
 0x127   :  { %2312 = vmatprep.subr.bf16.mxu1 %v368_v31 }
 0x12a   :  { %2313 = vmatpush3.bf16.msra.mxu1 %v360_v32 }
 0x12b   :  { %2314 = vmatprep.subr.bf16.mxu1 %v367_v33 }
 0x12e   :  { %2315 = vmatpush3.bf16.msra.mxu1 %v359_v34 }
 0x12f   :  { %2316 = vmatprep.subr.bf16.mxu1 %v366_v35 }
 0x132   :  { %2317 = vmatpush3.bf16.msra.mxu1 %v358_v1  ;;  %v3390_v1 = vld [vmem:[%s4123_s0 + $0xa4] ss:$8 sps:$4 sm:$0xff]  }
 0x133   :  { %2318 = vmatprep.subr.bf16.mxu1 %v365_v36 }
 0x136   :  { %2319 = vmatpush3.bf16.msra.mxu1 %v357_v37 }
 0x137   :  { %2320 = vmatprep.subr.bf16.mxu1 %v364_v38 }
 0x13a   :  { %2321 = vmatpush3.bf16.msra.mxu1 %v356_v60  ;;  %v3367_v60 = vld [vmem:[%s4123_s0 + $0x80] ss:$8 sps:$4 sm:$0xff]  }
 0x13b   :  { %2322 = vmatprep.subr.bf16.mxu1 %v363_v39 }
 0x13e   :  { %2323 = vmatpush3.bf16.msra.mxu1 %v355_v43 }
 0x141   :  { %564 = vmatmul.mubr.bf16.vlgmr.msra.gmra.mxu1 %v3266_v41 }
 0x142   :  { %571 = vmatprep.mubr.bf16.mxu1 %v3276_v44 }
 0x149   :  { %572 = vmatmul.mubr.bf16.gmra.mxu1 %v3283_v45 }
 0x14a   :  { %579 = vmatprep.mubr.bf16.mxu1 %v3288_v46 }
 0x151   :  { %580 = vmatmul.mubr.bf16.gmra.mxu1 %v3295_v47 }
 0x152   :  { %587 = vmatprep.mubr.bf16.mxu1 %v3300_v48 }
 0x159   :  { %588 = vmatmul.mubr.bf16.gmra.mxu1 %v3307_v49 }
 0x15a   :  { %595 = vmatprep.mubr.bf16.mxu1 %v3312_v50 }
 0x161   :  { %596 = vmatmul.mubr.bf16.gmra.mxu1 %v3319_v51 }
 0x162   :  { %603 = vmatprep.mubr.bf16.mxu1 %v3324_v52 }
 0x169   :  { %604 = vmatmul.mubr.bf16.gmra.mxu1 %v3331_v53 }
 0x16a   :  { %611 = vmatprep.mubr.bf16.mxu1 %v3336_v54 }
 0x171   :  { %612 = vmatmul.mubr.bf16.gmra.mxu1 %v3343_v55 }
 0x172   :  { %619 = vmatprep.mubr.bf16.mxu1 %v3348_v57 }
 0x179   :  { %620 = vmatmul.mubr.bf16.gmra.mxu1 %v3355_v58 }
 0x17a   :  { %627 = vmatprep.mubr.bf16.mxu1 %v3360_v59 }
 0x181   :  { %628 = vmatmul.mubr.bf16.gmra.mxu1 %v3367_v60 }
 0x182   :  { %635 = vmatprep.mubr.bf16.mxu1 %v3372_v61 }
 0x189   :  { %636 = vmatmul.mubr.bf16.gmra.mxu1 %v3385_v0 }
 0x18a   :  { %643 = vmatprep.mubr.bf16.mxu1 %v3390_v1 }
 0x191   :  { %644 = vmatmul.mubr.bf16.gmra.mxu1 %v3403_v4 }
 0x192   :  { %651 = vmatprep.mubr.bf16.mxu1 %v3408_v5 }
 0x199   :  { %652 = vmatmul.mubr.bf16.gmra.mxu1 %v3421_v8 }
 0x19a   :  { %659 = vmatprep.mubr.bf16.mxu1 %v3426_v9 }
 0x1a1   :  { %660 = vmatmul.mubr.bf16.gmra.mxu1 %v3433_v10 }
 0x1a2   :  { %667 = vmatprep.mubr.bf16.mxu1 %v3438_v11 }
 0x1a9   :  { %668 = vmatmul.mubr.bf16.gmra.mxu1 %v3445_v12 }
 0x1aa   :  { %675 = vmatprep.mubr.bf16.mxu1 %v3450_v13 }
 0x1b1   :  { %676 = vmatmul.mubr.bf16.gmra.mxu1 %v3457_v14 }
 0x1b2   :  { %683 = vmatprep.mubr.bf16.mxu1 %v3462_v15 }
 0x1b9   :  { %684 = vmatmul.mubr.bf16.gmra.mxu1 %v3469_v16 }
 0x201   :  { %v2324_v17 = vpop.f32.mrf.mxu1 }
 0x203   :  { %v2325_v19 = vpop.f32.mrf.mxu1 }
 0x204   :  { %v2326_v20 = vadd.f32 %v2325_v19, %v2324_v17 }
 0x205   :  { %v2327_v21 = vpop.f32.mrf.mxu1 }
 0x206   :  { %v698_v22 = vmul.f32 %v2326_v20, %v3475_v18 }
 0x207   :  { %v2328_v24 = vpop.f32.mrf.mxu1 }
 0x208   :  { %v2329_v25 = vadd.f32 %v2328_v24, %v2327_v21  ;;  %v3484_v27 = vadd.f32 %v3481_v23, %v698_v22 }
 0x209   :  { %v2330_v26 = vpop.f32.mrf.mxu1 }
 0x20a   :  { %4214 = vst [vmem:[#allocation9_spill] sm:$0xff] %v3484_v27  ;;  %v699_v28 = vmul.f32 %v2329_v25, %v3475_v18  ;;  %v4149_v33 = vmax.f32 %v3484_v27, 0.0 }
 0x20b   :  { %v2331_v29 = vpop.f32.mrf.mxu1 }
 0x20c   :  { %v3488_v30 = vadd.f32 %v3481_v23, %v699_v28  ;;  %v2332_v31 = vadd.f32 %v2331_v29, %v2330_v26 }
 0x20d   :  { %v2333_v32 = vpop.f32.mrf.mxu1 }
 0x20e   :  { %4215 = vst [vmem:[#allocation10_spill] sm:$0xff] %v3488_v30  ;;  %v700_v34 = vmul.f32 %v2332_v31, %v3475_v18  ;;  %v4146_v35 = vmax.f32 %v3488_v30, 0.0 }
 0x20f   :  { %v2334_v36 = vpop.f32.mrf.mxu1 }
 0x210   :  { %v2335_v37 = vadd.f32 %v2334_v36, %v2333_v32  ;;  %v800_v38 = vpack.c.bf16 %v4146_v35, %v4149_v33  ;;  %v3498_v40 = vadd.f32 %v3481_v23, %v700_v34 }
 0x211   :  { %v2336_v39 = vpop.f32.mrf.mxu1 }
 0x212   :  { %4216 = vst [vmem:[#allocation11_spill] sm:$0xff] %v3498_v40  ;;  %v701_v42 = vmul.f32 %v2335_v37, %v3475_v18  ;;  %2815 = vmatprep.mubr.bf16.mxu0 %v800_v38  ;;  %v4145_v3 = vmax.f32 %v3498_v40, 0.0 }
 0x213   :  { %v2337_v43 = vpop.f32.mrf.mxu1 }
 0x214   :  { %v3502_v62 = vadd.f32 %v3481_v23, %v701_v42  ;;  %v2338_v63 = vadd.f32 %v2337_v43, %v2336_v39 }
 0x215   :  { %v2339_v2 = vpop.f32.mrf.mxu1 }
 0x216   :  { %4217 = vst [vmem:[#allocation12_spill] sm:$0xff] %v3502_v62  ;;  %v4142_v6 = vmax.f32 %v3502_v62, 0.0  ;;  %v702_v7 = vmul.f32 %v2338_v63, %v3475_v18 }
 0x217   :  { %v2340_v17 = vpop.f32.mrf.mxu1 }
 0x218   :  { %v801_v19 = vpack.c.bf16 %v4142_v6, %v4145_v3  ;;  %v2341_v20 = vadd.f32 %v2340_v17, %v2339_v2  ;;  %v3512_v22 = vadd.f32 %v3481_v23, %v702_v7 }
 0x219   :  { %v2342_v21 = vpop.f32.mrf.mxu1 }
 0x21a   :  { %4218 = vst [vmem:[#allocation13_spill] sm:$0xff] %v3512_v22  ;;  %v703_v24 = vmul.f32 %v2341_v20, %v3475_v18  ;;  %2816 = vmatmul.mubr.bf16.vlgmr.msra.gmra.mxu0 %v801_v19  ;;  %v4141_v31 = vmax.f32 %v3512_v22, 0.0 }
 0x21b   :  { %v2343_v25 = vpop.f32.mrf.mxu1 }
 0x21c   :  { %v3516_v26 = vadd.f32 %v3481_v23, %v703_v24  ;;  %v2344_v28 = vadd.f32 %v2343_v25, %v2342_v21 }
 0x21d   :  { %v2345_v29 = vpop.f32.mrf.mxu1 }
 0x21e   :  { %4219 = vst [vmem:[#allocation14_spill] sm:$0xff] %v3516_v26  ;;  %v704_v32 = vmul.f32 %v2344_v28, %v3475_v18  ;;  %v4138_v34 = vmax.f32 %v3516_v26, 0.0 }
 0x21f   :  { %v2346_v36 = vpop.f32.mrf.mxu1 }
 0x220   :  { %v2347_v37 = vadd.f32 %v2346_v36, %v2345_v29  ;;  %v802_v38 = vpack.c.bf16 %v4138_v34, %v4141_v31  ;;  %v3526_v42 = vadd.f32 %v3481_v23, %v704_v32 }
 0x221   :  { %v2348_v39 = vpop.f32.mrf.mxu1 }
 0x222   :  { %4220 = vst [vmem:[#allocation15_spill] sm:$0xff] %v3526_v42  ;;  %v705_v43 = vmul.f32 %v2347_v37, %v3475_v18  ;;  %2819 = vmatprep.mubr.bf16.mxu0 %v802_v38  ;;  %v4137_v19 = vmax.f32 %v3526_v42, 0.0 }
 0x223   :  { %v2349_v63 = vpop.f32.mrf.mxu1 }
 0x224   :  { %v3530_v2 = vadd.f32 %v3481_v23, %v705_v43  ;;  %v2350_v7 = vadd.f32 %v2349_v63, %v2348_v39 }
 0x225   :  { %v2351_v17 = vpop.f32.mrf.mxu1 }
 0x226   :  { %4221 = vst [vmem:[#allocation16_spill] sm:$0xff] %v3530_v2  ;;  %v706_v20 = vmul.f32 %v2350_v7, %v3475_v18  ;;  %v4136_v21 = vmax.f32 %v3530_v2, 0.0 }
 0x227   :  { %v2352_v24 = vpop.f32.mrf.mxu1 }
 0x228   :  { %v2353_v25 = vadd.f32 %v2352_v24, %v2351_v17  ;;  %v803_v28 = vpack.c.bf16 %v4136_v21, %v4137_v19  ;;  %v3540_v32 = vadd.f32 %v3481_v23, %v706_v20 }
 0x229   :  { %v2354_v29 = vpop.f32.mrf.mxu1 }
 0x22a   :  { %4222 = vst [vmem:[#allocation17_spill] sm:$0xff] %v3540_v32  ;;  %v707_v36 = vmul.f32 %v2353_v25, %v3475_v18  ;;  %2820 = vmatmul.mubr.bf16.gmra.mxu0 %v803_v28  ;;  %v4140_v63 = vmax.f32 %v3540_v32, 0.0 }
 0x22b   :  { %v2355_v37 = vpop.f32.mrf.mxu1 }
 0x22c   :  { %v3544_v38 = vadd.f32 %v3481_v23, %v707_v36  ;;  %v2356_v39 = vadd.f32 %v2355_v37, %v2354_v29 }
 0x22d   :  { %v2357_v43 = vpop.f32.mrf.mxu1 }
 0x22e   :  { %4223 = vst [vmem:[#allocation18_spill] sm:$0xff] %v3544_v38  ;;  %v708_v7 = vmul.f32 %v2356_v39, %v3475_v18  ;;  %v4139_v17 = vmax.f32 %v3544_v38, 0.0 }
 0x22f   :  { %v2358_v24 = vpop.f32.mrf.mxu1 }
 0x230   :  { %v2359_v21 = vadd.f32 %v2358_v24, %v2357_v43  ;;  %v804_v20 = vpack.c.bf16 %v4139_v17, %v4140_v63  ;;  %v3554_v28 = vadd.f32 %v3481_v23, %v708_v7 }
 0x231   :  { %v2360_v25 = vpop.f32.mrf.mxu1 }
 0x232   :  { %4224 = vst [vmem:[#allocation19_spill] sm:$0xff] %v3554_v28  ;;  %v709_v29 = vmul.f32 %v2359_v21, %v3475_v18  ;;  %2823 = vmatprep.mubr.bf16.mxu0 %v804_v20  ;;  %v4144_v43 = vmax.f32 %v3554_v28, 0.0 }
 0x233   :  { %v2361_v36 = vpop.f32.mrf.mxu1 }
 0x234   :  { %v3558_v37 = vadd.f32 %v3481_v23, %v709_v29  ;;  %v2362_v39 = vadd.f32 %v2361_v36, %v2360_v25 }
 0x235   :  { %v2363_v19 = vpop.f32.mrf.mxu1 }
 0x236   :  { %4225 = vst [vmem:[#allocation20_spill] sm:$0xff] %v3558_v37  ;;  %v710_v24 = vmul.f32 %v2362_v39, %v3475_v18  ;;  %v4143_v34 = vmax.f32 %v3558_v37, 0.0 }
 0x237   :  { %v2364_v17 = vpop.f32.mrf.mxu1 }
 0x238   :  { %v2365_v63 = vadd.f32 %v2364_v17, %v2363_v19  ;;  %v805_v21 = vpack.c.bf16 %v4143_v34, %v4144_v43  ;;  %v3568_v20 = vadd.f32 %v3481_v23, %v710_v24 }
 0x239   :  { %v2366_v7 = vpop.f32.mrf.mxu1 }
 0x23a   :  { %4226 = vst [vmem:[#allocation21_spill] sm:$0xff] %v3568_v20  ;;  %v711_v25 = vmul.f32 %v2365_v63, %v3475_v18  ;;  %2824 = vmatmul.mubr.bf16.gmra.mxu0 %v805_v21  ;;  %v4148_v19 = vmax.f32 %v3568_v20, 0.0 }
 0x23b   :  { %v2367_v29 = vpop.f32.mrf.mxu1 }
 0x23c   :  { %v3572_v36 = vadd.f32 %v3481_v23, %v711_v25  ;;  %v2368_v39 = vadd.f32 %v2367_v29, %v2366_v7 }
 0x23d   :  { %v2369_v31 = vpop.f32.mrf.mxu1 }
 0x23e   :  { %4227 = vst [vmem:[#allocation22_spill] sm:$0xff] %v3572_v36  ;;  %v712_v17 = vmul.f32 %v2368_v39, %v3475_v18  ;;  %v4147_v6 = vmax.f32 %v3572_v36, 0.0 }
 0x23f   :  { %v2370_v34 = vpop.f32.mrf.mxu1 }
 0x240   :  { %v2371_v43 = vadd.f32 %v2370_v34, %v2369_v31  ;;  %v806_v63 = vpack.c.bf16 %v4147_v6, %v4148_v19  ;;  %v3582_v21 = vadd.f32 %v3481_v23, %v712_v17 }
 0x241   :  { %v2372_v24 = vpop.f32.mrf.mxu1 }
 0x242   :  { %4228 = vst [vmem:[#allocation23_spill] sm:$0xff] %v3582_v21  ;;  %v713_v7 = vmul.f32 %v2371_v43, %v3475_v18  ;;  %2827 = vmatprep.mubr.bf16.mxu0 %v806_v63  ;;  %v4152_v31 = vmax.f32 %v3582_v21, 0.0 }
 0x243   :  { %v2373_v25 = vpop.f32.mrf.mxu1 }
 0x244   :  { %v3586_v29 = vadd.f32 %v3481_v23, %v713_v7  ;;  %v2374_v39 = vadd.f32 %v2373_v25, %v2372_v24 }
 0x245   :  { %v2375_v3 = vpop.f32.mrf.mxu1 }
 0x246   :  { %4229 = vst [vmem:[#allocation24_spill] sm:$0xff] %v3586_v29  ;;  %v714_v34 = vmul.f32 %v2374_v39, %v3475_v18  ;;  %v4151_v35 = vmax.f32 %v3586_v29, 0.0 }
 0x247   :  { %v2376_v6 = vpop.f32.mrf.mxu1 }
 0x248   :  { %v2377_v19 = vadd.f32 %v2376_v6, %v2375_v3  ;;  %v807_v43 = vpack.c.bf16 %v4151_v35, %v4152_v31  ;;  %v3596_v63 = vadd.f32 %v3481_v23, %v714_v34 }
 0x249   :  { %v2378_v17 = vpop.f32.mrf.mxu1 }
 0x24a   :  { %4230 = vst [vmem:[#allocation25_spill] sm:$0xff] %v3596_v63  ;;  %v715_v24 = vmul.f32 %v2377_v19, %v3475_v18  ;;  %2828 = vmatmul.mubr.bf16.gmra.mxu0 %v807_v43  ;;  %v4156_v3 = vmax.f32 %v3596_v63, 0.0 }
 0x24b   :  { %v2379_v7 = vpop.f32.mrf.mxu1 }
 0x24c   :  { %v3600_v25 = vadd.f32 %v3481_v23, %v715_v24  ;;  %v2380_v39 = vadd.f32 %v2379_v7, %v2378_v17 }
 0x24d   :  { %v2381_v33 = vpop.f32.mrf.mxu1 }
 0x24e   :  { %4231 = vst [vmem:[#allocation26_spill] sm:$0xff] %v3600_v25  ;;  %v716_v6 = vmul.f32 %v2380_v39, %v3475_v18  ;;  %v4155_v29 = vmax.f32 %v3600_v25, 0.0 }
 0x24f   :  { %v2382_v35 = vpop.f32.mrf.mxu1 }
 0x250   :  { %v2383_v31 = vadd.f32 %v2382_v35, %v2381_v33  ;;  %v808_v19 = vpack.c.bf16 %v4155_v29, %v4156_v3  ;;  %v3610_v43 = vadd.f32 %v3481_v23, %v716_v6 }
 0x251   :  { %v2384_v34 = vpop.f32.mrf.mxu1 }
 0x252   :  { %4232 = vst [vmem:[#allocation27_spill] sm:$0xff] %v3610_v43  ;;  %v717_v17 = vmul.f32 %v2383_v31, %v3475_v18  ;;  %2831 = vmatprep.mubr.bf16.mxu0 %v808_v19  ;;  %v4160_v33 = vmax.f32 %v3610_v43, 0.0 }
 0x253   :  { %v2385_v24 = vpop.f32.mrf.mxu1 }
 0x254   :  { %v3614_v7 = vadd.f32 %v3481_v23, %v717_v17  ;;  %v2386_v39 = vadd.f32 %v2385_v24, %v2384_v34 }
 0x255   :  { %v2387_v21 = vpop.f32.mrf.mxu1 }
 0x256   :  { %4233 = vst [vmem:[#allocation28_spill] sm:$0xff] %v3614_v7  ;;  %v718_v35 = vmul.f32 %v2386_v39, %v3475_v18  ;;  %v4159_v25 = vmax.f32 %v3614_v7, 0.0 }
 0x257   :  { %v2388_v29 = vpop.f32.mrf.mxu1 }
 0x258   :  { %v2389_v3 = vadd.f32 %v2388_v29, %v2387_v21  ;;  %v809_v31 = vpack.c.bf16 %v4159_v25, %v4160_v33  ;;  %v3624_v19 = vadd.f32 %v3481_v23, %v718_v35 }
 0x259   :  { %v2390_v6 = vpop.f32.mrf.mxu1 }
 0x25a   :  { %4234 = vst [vmem:[#allocation29_spill] sm:$0xff] %v3624_v19  ;;  %v719_v34 = vmul.f32 %v2389_v3, %v3475_v18  ;;  %2832 = vmatmul.mubr.bf16.gmra.mxu0 %v809_v31  ;;  %v4164_v21 = vmax.f32 %v3624_v19, 0.0 }
 0x25b   :  { %v2391_v17 = vpop.f32.mrf.mxu1 }
 0x25c   :  { %v3628_v24 = vadd.f32 %v3481_v23, %v719_v34  ;;  %v2392_v39 = vadd.f32 %v2391_v17, %v2390_v6 }
 0x25d   :  { %v2393_v63 = vpop.f32.mrf.mxu1 }
 0x25e   :  { %4235 = vst [vmem:[#allocation30_spill] sm:$0xff] %v3628_v24  ;;  %v720_v29 = vmul.f32 %v2392_v39, %v3475_v18  ;;  %v4163_v7 = vmax.f32 %v3628_v24, 0.0 }
 0x25f   :  { %v2394_v25 = vpop.f32.mrf.mxu1 }
 0x260   :  { %v2395_v33 = vadd.f32 %v2394_v25, %v2393_v63  ;;  %v810_v3 = vpack.c.bf16 %v4163_v7, %v4164_v21  ;;  %v3638_v31 = vadd.f32 %v3481_v23, %v720_v29 }
 0x261   :  { %v2396_v35 = vpop.f32.mrf.mxu1 }
 0x262   :  { %4236 = vst [vmem:[#allocation31_spill] sm:$0xff] %v3638_v31  ;;  %v721_v6 = vmul.f32 %v2395_v33, %v3475_v18  ;;  %2835 = vmatprep.mubr.bf16.mxu0 %v810_v3  ;;  %v4168_v63 = vmax.f32 %v3638_v31, 0.0 }
 0x263   :  { %v2397_v34 = vpop.f32.mrf.mxu1 }
 0x264   :  { %v3642_v17 = vadd.f32 %v3481_v23, %v721_v6  ;;  %v2398_v39 = vadd.f32 %v2397_v34, %v2396_v35 }
 0x265   :  { %v2399_v43 = vpop.f32.mrf.mxu1 }
 0x266   :  { %4237 = vst [vmem:[#allocation32_spill] sm:$0xff] %v3642_v17  ;;  %v722_v25 = vmul.f32 %v2398_v39, %v3475_v18  ;;  %v4167_v24 = vmax.f32 %v3642_v17, 0.0 }
 0x267   :  { %v2400_v7 = vpop.f32.mrf.mxu1 }
 0x268   :  { %v2401_v21 = vadd.f32 %v2400_v7, %v2399_v43  ;;  %v811_v33 = vpack.c.bf16 %v4167_v24, %v4168_v63  ;;  %v3652_v3 = vadd.f32 %v3481_v23, %v722_v25 }
 0x269   :  { %v2402_v29 = vpop.f32.mrf.mxu1 }
 0x26a   :  { %4238 = vst [vmem:[#allocation33_spill] sm:$0xff] %v3652_v3  ;;  %v723_v35 = vmul.f32 %v2401_v21, %v3475_v18  ;;  %2836 = vmatmul.mubr.bf16.gmra.mxu0 %v811_v33  ;;  %v4172_v43 = vmax.f32 %v3652_v3, 0.0 }
 0x26b   :  { %v2403_v6 = vpop.f32.mrf.mxu1 }
 0x26c   :  { %v3656_v34 = vadd.f32 %v3481_v23, %v723_v35  ;;  %v2404_v39 = vadd.f32 %v2403_v6, %v2402_v29 }
 0x26d   :  { %v2405_v19 = vpop.f32.mrf.mxu1 }
 0x26e   :  { %4239 = vst [vmem:[#allocation34_spill] sm:$0xff] %v3656_v34  ;;  %v4171_v7 = vmax.f32 %v3656_v34, 0.0  ;;  %v724_v17 = vmul.f32 %v2404_v39, %v3475_v18 }
 0x26f   :  { %v2406_v24 = vpop.f32.mrf.mxu1 }
 0x270   :  { %v2407_v63 = vadd.f32 %v2406_v24, %v2405_v19  ;;  %v812_v21 = vpack.c.bf16 %v4171_v7, %v4172_v43  ;;  %v3666_v33 = vadd.f32 %v3481_v23, %v724_v17 }
 0x271   :  { %v2408_v25 = vpop.f32.mrf.mxu1 }
 0x272   :  { %4240 = vst [vmem:[#allocation35_spill] sm:$0xff] %v3666_v33  ;;  %v725_v29 = vmul.f32 %v2407_v63, %v3475_v18  ;;  %2839 = vmatprep.mubr.bf16.mxu0 %v812_v21  ;;  %v4176_v19 = vmax.f32 %v3666_v33, 0.0 }
 0x273   :  { %v2409_v35 = vpop.f32.mrf.mxu1 }
 0x274   :  { %v3670_v6 = vadd.f32 %v3481_v23, %v725_v29  ;;  %v2410_v31 = vadd.f32 %v2409_v35, %v2408_v25 }
 0x275   :  { %v2411_v39 = vpop.f32.mrf.mxu1 }
 0x276   :  { %4241 = vst [vmem:[#allocation36_spill] sm:$0xff] %v3670_v6  ;;  %v4175_v24 = vmax.f32 %v3670_v6, 0.0  ;;  %v726_v34 = vmul.f32 %v2410_v31, %v3475_v18 }
 0x277   :  { %v2412_v7 = vpop.f32.mrf.mxu1 }
 0x278   :  { %v2413_v43 = vadd.f32 %v2412_v7, %v2411_v39  ;;  %v813_v17 = vpack.c.bf16 %v4175_v24, %v4176_v19  ;;  %v3680_v21 = vadd.f32 %v3481_v23, %v726_v34 }
 0x279   :  { %v2414_v63 = vpop.f32.mrf.mxu1 }
 0x27a   :  { %4242 = vst [vmem:[#allocation37_spill] sm:$0xff] %v3680_v21  ;;  %v727_v25 = vmul.f32 %v2413_v43, %v3475_v18  ;;  %2840 = vmatmul.mubr.bf16.gmra.mxu0 %v813_v17  ;;  %v4178_v7 = vmax.f32 %v3680_v21, 0.0 }
 0x27b   :  { %v2415_v29 = vpop.f32.mrf.mxu1 }
 0x27c   :  { %v3684_v35 = vadd.f32 %v3481_v23, %v727_v25  ;;  %v2416_v3 = vadd.f32 %v2415_v29, %v2414_v63 }
 0x27d   :  { %v2417_v31 = vpop.f32.mrf.mxu1 }
 0x27e   :  { %4243 = vst [vmem:[#allocation38_spill] sm:$0xff] %v3684_v35  ;;  %v4177_v39 = vmax.f32 %v3684_v35, 0.0  ;;  %v728_v6 = vmul.f32 %v2416_v3, %v3475_v18 }
 0x27f   :  { %v2418_v24 = vpop.f32.mrf.mxu1 }
 0x280   :  { %v2419_v19 = vadd.f32 %v2418_v24, %v2417_v31  ;;  %v814_v34 = vpack.c.bf16 %v4177_v39, %v4178_v7  ;;  %v3694_v43 = vadd.f32 %v3481_v23, %v728_v6 }
 0x282   :  { %4244 = vst [vmem:[#allocation39_spill] sm:$0xff] %v3694_v43  ;;  %v729_v17 = vmul.f32 %v2419_v19, %v3475_v18  ;;  %2843 = vmatprep.mubr.bf16.mxu0 %v814_v34  ;;  %v4184_v25 = vmax.f32 %v3694_v43, 0.0 }
 0x284   :  { %v3698_v63 = vadd.f32 %v3481_v23, %v729_v17 }
 0x286   :  { %4245 = vst [vmem:[#allocation40_spill] sm:$0xff] %v3698_v63  ;;  %v4183_v3 = vmax.f32 %v3698_v63, 0.0 }
 0x288   :  { %v815_v24 = vpack.c.bf16 %v4183_v3, %v4184_v25 }
 0x28a   :  { %2844 = vmatmul.mubr.bf16.gmra.mxu0 %v815_v24 }
 0x28b   :  { %1091 = vmatprep.mubr.bf16.mxu0 %v3253_v56 }
 0x2da   :  { %v2817_v6 = vpop.f32.mrf.mxu0 }
 0x2dc   :  { %v3707_v29 = vpop.f32.mrf.mxu0 }
 0x2de   :  { %v2818_v18 = vpop.f32.mrf.mxu0 }
 0x2df   :  { %v1044_v19 = vpack.c.bf16 %v2818_v18, %v2817_v6 }
 0x2e0   :  { %v3709_v31 = vpop.f32.mrf.mxu0 }
 0x2ea   :  { %v2821_v23 = vpop.f32.mrf.mxu0 }
 0x2ec   :  { %v930_v34 = vpop.f32.mrf.mxu0 }
 0x2ee   :  { %v2822_v17 = vpop.f32.mrf.mxu0 }
 0x2ef   :  { %v1046_v39 = vpack.c.bf16 %v2822_v17, %v2821_v23 }
 0x2f0   :  { %v933_v7 = vpop.f32.mrf.mxu0 }
 0x2fa   :  { %v2825_v35 = vpop.f32.mrf.mxu0 }
 0x2fc   :  { %v946_v43 = vpop.f32.mrf.mxu0 }
 0x2fe   :  { %v2826_v21 = vpop.f32.mrf.mxu0 }
 0x2ff   :  { %v1048_v14 = vpack.c.bf16 %v2826_v21, %v2825_v35 }
 0x300   :  { %v949_v63 = vpop.f32.mrf.mxu0 }
 0x301   :  { %v1047_v12 = vpack.c.bf16 %v949_v63, %v946_v43  ;;  %v4257_v63 = vld [vmem:[#allocation11_spill] sm:$0xff] }
 0x30a   :  { %v2829_v3 = vpop.f32.mrf.mxu0 }
 0x30c   :  { %v962_v24 = vpop.f32.mrf.mxu0 }
 0x30e   :  { %v2830_v25 = vpop.f32.mrf.mxu0 }
 0x30f   :  { %v1050_v40 = vpack.c.bf16 %v2830_v25, %v2829_v3  ;;  %v4258_v25 = vmax.f32 %v4257_v63, 0.0 }
 0x310   :  { %v965_v56 = vpop.f32.mrf.mxu0 }
 0x311   :  { %v1049_v16 = vpack.c.bf16 %v965_v56, %v962_v24 }
 0x31a   :  { %v2833_v33 = vpop.f32.mrf.mxu0 }
 0x31c   :  { %v978_v36 = vpop.f32.mrf.mxu0 }
 0x31e   :  { %v2834_v20 = vpop.f32.mrf.mxu0 }
 0x320   :  { %v981_v37 = vpop.f32.mrf.mxu0 }
 0x32a   :  { %v2837_v6 = vpop.f32.mrf.mxu0 }
 0x32c   :  { %v994_v18 = vpop.f32.mrf.mxu0 }
 0x32e   :  { %v2838_v28 = vpop.f32.mrf.mxu0 }
 0x32f   :  { %v1054_v11 = vpack.c.bf16 %v2838_v28, %v2837_v6 }
 0x330   :  { %v997_v38 = vpop.f32.mrf.mxu0 }
 0x331   :  { %v1053_v10 = vpack.c.bf16 %v997_v38, %v994_v18 }
 0x33a   :  { %v2841_v32 = vpop.f32.mrf.mxu0 }
 0x33c   :  { %v1010_v2 = vpop.f32.mrf.mxu0 }
 0x33e   :  { %v2842_v23 = vpop.f32.mrf.mxu0 }
 0x33f   :  { %v1056_v15 = vpack.c.bf16 %v2842_v23, %v2841_v32  ;;  %v4255_v32 = vld [vmem:[#allocation10_spill] sm:$0xff] }
 0x340   :  { %v1013_v17 = vpop.f32.mrf.mxu0  ;;  %v4256_v38 = vmax.f32 %v4255_v32, 0.0 }
 0x341   :  { %v1055_v13 = vpack.c.bf16 %v1013_v17, %v1010_v2 }
 0x34a   :  { %v2845_v42 = vpop.f32.mrf.mxu0 }
 0x34c   :  { %v1026_v26 = vpop.f32.mrf.mxu0 }
 0x34e   :  { %v2846_v22 = vpop.f32.mrf.mxu0 }
 0x34f   :  { %v1058_v62 = vpack.c.bf16 %v2846_v22, %v2845_v42  ;;  %v1045_v22 = vpack.c.bf16 %v933_v7, %v930_v34  ;;  %v4259_v34 = vld [vmem:[#allocation12_spill] sm:$0xff] }
 0x350   :  { %v1029_v30 = vpop.f32.mrf.mxu0  ;;  %v4260_v24 = vmax.f32 %v4259_v34, 0.0 }
 0x351   :  { %v1057_v27 = vpack.c.bf16 %v1029_v30, %v1026_v26  ;;  %2444 = vmatprep.subr.bf16.mxu0 %v1058_v62  ;;  %v1052_v30 = vpack.c.bf16 %v2834_v20, %v2833_v33 }
 0x352   :  { %2445 = vmatpush3.bf16.msra.mxu0 %v1050_v40  ;;  %v4253_v40 = vld [vmem:[#allocation9_spill] sm:$0xff] }
 0x353   :  { %2446 = vmatprep.subr.bf16.mxu0 %v1057_v27  ;;  %v1051_v27 = vpack.c.bf16 %v981_v37, %v978_v36  ;;  %v4254_v62 = vmax.f32 %v4253_v40, 0.0  ;;  %v4267_v40 = vld [vmem:[#allocation16_spill] sm:$0xff] }
 0x356   :  { %2447 = vmatpush3.bf16.msra.mxu0 %v1049_v16 }
 0x357   :  { %2448 = vmatprep.subr.bf16.mxu0 %v1056_v15  ;;  %v3007_v15 = vld [vmem:[%s4127_s8 + $0x38] sm:$0xff]  }
 0x358   :  { %2847 = vmatprep.subr.bf16.mxu1 %v3007_v15 }
 0x359   :  { %2848 = vmatpush3.bf16.msra.mxu1 %v3007_v15 }
 0x35a   :  { %2449 = vmatpush3.bf16.msra.mxu0 %v1048_v14 }
 0x35b   :  { %2450 = vmatprep.subr.bf16.mxu0 %v1055_v13  ;;  %v3008_v13 = vld [vmem:[%s4127_s8 + $0x30] sm:$0xff]  }
 0x35c   :  { %2849 = vmatprep.subr.bf16.mxu1 %v3008_v13 }
 0x35d   :  { %2850 = vmatpush3.bf16.msra.mxu1 %v3008_v13 }
 0x35e   :  { %2451 = vmatpush3.bf16.msra.mxu0 %v1047_v12 }
 0x35f   :  { %2452 = vmatprep.subr.bf16.mxu0 %v1054_v11  ;;  %v1043_v11 = vpack.c.bf16 %v3709_v31, %v3707_v29 }
 0x362   :  { %2453 = vmatpush3.bf16.msra.mxu0 %v1046_v39 }
 0x363   :  { %2454 = vmatprep.subr.bf16.mxu0 %v1053_v10 }
 0x366   :  { %2455 = vmatpush3.bf16.msra.mxu0 %v1045_v22 }
 0x367   :  { %2456 = vmatprep.subr.bf16.mxu0 %v1052_v30 }
 0x36a   :  { %2457 = vmatpush3.bf16.msra.mxu0 %v1044_v19 }
 0x36b   :  { %2458 = vmatprep.subr.bf16.mxu0 %v1051_v27 }
 0x36e   :  { %2459 = vmatpush3.bf16.msra.mxu0 %v1043_v11 }
 0x371   :  { %1092 = vmatmul.mubr.bf16.vlgmr.msra.gmra.mxu0 %v3266_v41  ;;  %v3009_v41 = vld [vmem:[%s4127_s8 + $0x28] sm:$0xff]  }
 0x372   :  { %1099 = vmatprep.mubr.bf16.mxu0 %v3276_v44  ;;  %2851 = vmatprep.subr.bf16.mxu1 %v3009_v41  ;;  %v3010_v44 = vld [vmem:[%s4127_s8 + $0x20] sm:$0xff]  }
 0x373   :  { %2852 = vmatpush3.bf16.msra.mxu1 %v3009_v41 }
 0x374   :  { %2853 = vmatprep.subr.bf16.mxu1 %v3010_v44 }
 0x377   :  { %2854 = vmatpush3.bf16.msra.mxu1 %v3010_v44 }
 0x379   :  { %1100 = vmatmul.mubr.bf16.gmra.mxu0 %v3283_v45  ;;  %v3011_v45 = vld [vmem:[%s4127_s8 + $0x18] sm:$0xff]  }
 0x37a   :  { %1107 = vmatprep.mubr.bf16.mxu0 %v3288_v46  ;;  %2855 = vmatprep.subr.bf16.mxu1 %v3011_v45  ;;  %v3012_v46 = vld [vmem:[%s4127_s8 + $0x10] sm:$0xff]  }
 0x37b   :  { %2856 = vmatpush3.bf16.msra.mxu1 %v3011_v45  ;;  %v4261_v45 = vld [vmem:[#allocation13_spill] sm:$0xff] }
 0x37c   :  { %2857 = vmatprep.subr.bf16.mxu1 %v3012_v46 }
 0x37f   :  { %2858 = vmatpush3.bf16.msra.mxu1 %v3012_v46  ;;  %v4262_v46 = vmax.f32 %v4261_v45, 0.0  ;;  %v4275_v45 = vld [vmem:[#allocation20_spill] sm:$0xff] }
 0x381   :  { %1108 = vmatmul.mubr.bf16.gmra.mxu0 %v3295_v47  ;;  %v3013_v47 = vld [vmem:[%s4127_s8 + $0x8] sm:$0xff]  }
 0x382   :  { %1115 = vmatprep.mubr.bf16.mxu0 %v3300_v48  ;;  %2859 = vmatprep.subr.bf16.mxu1 %v3013_v47  ;;  %v3014_v48 = vld [vmem:[%s4127_s8] sm:$0xff]  }
 0x383   :  { %2860 = vmatpush3.bf16.msra.mxu1 %v3013_v47 }
 0x384   :  { %2861 = vmatprep.subr.bf16.mxu1 %v3014_v48 }
 0x387   :  { %2862 = vmatpush3.bf16.msra.mxu1 %v3014_v48 }
 0x389   :  { %1116 = vmatmul.mubr.bf16.gmra.mxu0 %v3307_v49  ;;  %v4246_v49 = vld [vmem:[#allocation2_spill] sm:$0xff] }
 0x38a   :  { %1123 = vmatprep.mubr.bf16.mxu0 %v3312_v50  ;;  %v4247_v50 = vld [vmem:[#allocation3_spill] sm:$0xff] }
 0x391   :  { %1124 = vmatmul.mubr.bf16.gmra.mxu0 %v3319_v51  ;;  %v4248_v51 = vld [vmem:[#allocation4_spill] sm:$0xff] }
 0x392   :  { %1131 = vmatprep.mubr.bf16.mxu0 %v3324_v52  ;;  %v4249_v52 = vld [vmem:[#allocation5_spill] sm:$0xff] }
 0x399   :  { %1132 = vmatmul.mubr.bf16.gmra.mxu0 %v3331_v53  ;;  %v4250_v53 = vld [vmem:[#allocation6_spill] sm:$0xff] }
 0x39a   :  { %1139 = vmatprep.mubr.bf16.mxu0 %v3336_v54  ;;  %v4251_v54 = vld [vmem:[#allocation7_spill] sm:$0xff] }
 0x3a1   :  { %1140 = vmatmul.mubr.bf16.gmra.mxu0 %v3343_v55  ;;  %v4252_v55 = vld [vmem:[#allocation8_spill] sm:$0xff] }
 0x3a2   :  { %1147 = vmatprep.mubr.bf16.mxu0 %v3348_v57 }
 0x3a9   :  { %1148 = vmatmul.mubr.bf16.gmra.mxu0 %v3355_v58  ;;  %v3771_v58 = vld [vmem:[%s4128_s6] ss:$0 sm:$0xff] }
 0x3aa   :  { %1155 = vmatprep.mubr.bf16.mxu0 %v3360_v59 }
 0x3b1   :  { %1156 = vmatmul.mubr.bf16.gmra.mxu0 %v3367_v60 }
 0x3b2   :  { %1163 = vmatprep.mubr.bf16.mxu0 %v3372_v61  ;;  %v3776_v61 = vld [vmem:[%s4129_s7] ss:$0 sm:$0xff] }
 0x3b9   :  { %1164 = vmatmul.mubr.bf16.gmra.mxu0 %v3385_v0 }
 0x3ba   :  { %1171 = vmatprep.mubr.bf16.mxu0 %v3390_v1 }
 0x3c1   :  { %1172 = vmatmul.mubr.bf16.gmra.mxu0 %v3403_v4 }
 0x3c2   :  { %1179 = vmatprep.mubr.bf16.mxu0 %v3408_v5 }
 0x3c9   :  { %1180 = vmatmul.mubr.bf16.gmra.mxu0 %v3421_v8 }
 0x3ca   :  { %1187 = vmatprep.mubr.bf16.mxu0 %v3426_v9 }
 0x3d1   :  { %1188 = vmatmul.mubr.bf16.gmra.mxu0 %v4246_v49 }
 0x3d2   :  { %1195 = vmatprep.mubr.bf16.mxu0 %v4247_v50  ;;  %v4263_v50 = vld [vmem:[#allocation14_spill] sm:$0xff] }
 0x3d9   :  { %1196 = vmatmul.mubr.bf16.gmra.mxu0 %v4248_v51  ;;  %v4264_v51 = vmax.f32 %v4263_v50, 0.0 }
 0x3da   :  { %1203 = vmatprep.mubr.bf16.mxu0 %v4249_v52 }
 0x3e1   :  { %1204 = vmatmul.mubr.bf16.gmra.mxu0 %v4250_v53 }
 0x3e2   :  { %1211 = vmatprep.mubr.bf16.mxu0 %v4251_v54 }
 0x3e9   :  { %1212 = vmatmul.mubr.bf16.gmra.mxu0 %v4252_v55 }
 0x431   :  { %v2460_v57 = vpop.f32.mrf.mxu0 }
 0x433   :  { %v2461_v59 = vpop.f32.mrf.mxu0 }
 0x434   :  { %v2462_v60 = vadd.f32 %v2461_v59, %v2460_v57 }
 0x435   :  { %v2463_v0 = vpop.f32.mrf.mxu0 }
 0x436   :  { %v1226_v1 = vmul.f32 %v2462_v60, %v3771_v58 }
 0x437   :  { %v2464_v4 = vpop.f32.mrf.mxu0 }
 0x438   :  { %v1264_v5 = vadd.f32 %v3776_v61, %v1226_v1  ;;  %v2465_v8 = vadd.f32 %v2464_v4, %v2463_v0 }
 0x439   :  { %v2466_v9 = vpop.f32.mrf.mxu0 }
 0x43a   :  { %v1227_v10 = vmul.f32 %v2465_v8, %v3771_v58  ;;  %v1296_v26 = vadd.f32 %v1264_v5, %v4254_v62  ;;  %v4268_v62 = vmax.f32 %v4267_v40, 0.0 }
 0x43b   :  { %v2467_v12 = vpop.f32.mrf.mxu0 }
 0x43c   :  { %v1265_v14 = vadd.f32 %v3776_v61, %v1227_v10  ;;  %v2468_v16 = vadd.f32 %v2467_v12, %v2466_v9  ;;  %v1328_v33 = vmax.f32 %v1296_v26, 0.0  ;;  %v4265_v9 = vld [vmem:[#allocation15_spill] sm:$0xff] }
 0x43d   :  { %v2469_v42 = vpop.f32.mrf.mxu0  ;;  %v4266_v10 = vmax.f32 %v4265_v9, 0.0  ;;  %v4279_v9 = vld [vmem:[#allocation22_spill] sm:$0xff] }
 0x43e   :  { %v1228_v2 = vmul.f32 %v2468_v16, %v3771_v58  ;;  %v1297_v28 = vadd.f32 %v1265_v14, %v4256_v38 }
 0x43f   :  { %v2470_v37 = vpop.f32.mrf.mxu0 }
 0x440   :  { %v1266_v20 = vadd.f32 %v3776_v61, %v1228_v2  ;;  %v2471_v36 = vadd.f32 %v2470_v37, %v2469_v42  ;;  %v1329_v21 = vmax.f32 %v1297_v28, 0.0 }
 0x441   :  { %v2472_v35 = vpop.f32.mrf.mxu0 }
 0x442   :  { %v1229_v7 = vmul.f32 %v2471_v36, %v3771_v58  ;;  %v1360_v39 = vpack.c.bf16 %v1329_v21, %v1328_v33  ;;  %v1298_v3 = vadd.f32 %v1266_v20, %v4258_v25 }
 0x443   :  { %v2473_v43 = vpop.f32.mrf.mxu0 }
 0x444   :  { %v1267_v29 = vadd.f32 %v3776_v61, %v1229_v7  ;;  %v2474_v19 = vadd.f32 %v2473_v43, %v2472_v35  ;;  %2863 = vmatprep.mubr.bf16.mxu1 %v1360_v39  ;;  %v1330_v23 = vmax.f32 %v1298_v3, 0.0  ;;  %v4269_v7 = vld [vmem:[#allocation17_spill] sm:$0xff]  ;;  %v4271_v3 = vld [vmem:[#allocation18_spill] sm:$0xff] }
 0x445   :  { %v2475_v31 = vpop.f32.mrf.mxu0  ;;  %v4270_v39 = vmax.f32 %v4269_v7, 0.0  ;;  %v4283_v7 = vld [vmem:[#allocation24_spill] sm:$0xff] }
 0x446   :  { %v1299_v56 = vadd.f32 %v1267_v29, %v4260_v24  ;;  %v1230_v6 = vmul.f32 %v2474_v19, %v3771_v58  ;;  %v4272_v29 = vmax.f32 %v4271_v3, 0.0 }
 0x447   :  { %v2476_v18 = vpop.f32.mrf.mxu0 }
 0x448   :  { %v1331_v17 = vmax.f32 %v1299_v56, 0.0  ;;  %v1268_v22 = vadd.f32 %v3776_v61, %v1230_v6  ;;  %v2477_v30 = vadd.f32 %v2476_v18, %v2475_v31 }
 0x449   :  { %v2478_v27 = vpop.f32.mrf.mxu0 }
 0x44a   :  { %v1361_v15 = vpack.c.bf16 %v1331_v17, %v1330_v23  ;;  %v1231_v13 = vmul.f32 %v2477_v30, %v3771_v58  ;;  %v1300_v47 = vadd.f32 %v1268_v22, %v4262_v46  ;;  %v4276_v46 = vmax.f32 %v4275_v45, 0.0 }
 0x44b   :  { %v2479_v11 = vpop.f32.mrf.mxu0 }
 0x44c   :  { %v1269_v41 = vadd.f32 %v3776_v61, %v1231_v13  ;;  %v2480_v44 = vadd.f32 %v2479_v11, %v2478_v27  ;;  %2864 = vmatmul.mubr.bf16.vlgmr.msra.gmra.mxu1 %v1361_v15  ;;  %v1332_v57 = vmax.f32 %v1300_v47, 0.0  ;;  %v4273_v15 = vld [vmem:[#allocation19_spill] sm:$0xff] }
 0x44d   :  { %v2481_v48 = vpop.f32.mrf.mxu0  ;;  %v4274_v13 = vmax.f32 %v4273_v15, 0.0  ;;  %v4287_v15 = vld [vmem:[#allocation26_spill] sm:$0xff] }
 0x44e   :  { %v1232_v49 = vmul.f32 %v2480_v44, %v3771_v58  ;;  %v1301_v52 = vadd.f32 %v1269_v41, %v4264_v51 }
 0x44f   :  { %v2482_v53 = vpop.f32.mrf.mxu0 }
 0x450   :  { %v1270_v54 = vadd.f32 %v3776_v61, %v1232_v49  ;;  %v2483_v55 = vadd.f32 %v2482_v53, %v2481_v48  ;;  %v1333_v59 = vmax.f32 %v1301_v52, 0.0 }
 0x451   :  { %v2484_v60 = vpop.f32.mrf.mxu0 }
 0x452   :  { %v1233_v0 = vmul.f32 %v2483_v55, %v3771_v58  ;;  %v1362_v1 = vpack.c.bf16 %v1333_v59, %v1332_v57  ;;  %v1302_v12 = vadd.f32 %v1270_v54, %v4266_v10  ;;  %v4280_v10 = vmax.f32 %v4279_v9, 0.0 }
 0x453   :  { %v2485_v4 = vpop.f32.mrf.mxu0 }
 0x454   :  { %v1271_v5 = vadd.f32 %v3776_v61, %v1233_v0  ;;  %v2486_v8 = vadd.f32 %v2485_v4, %v2484_v60  ;;  %2867 = vmatprep.mubr.bf16.mxu1 %v1362_v1  ;;  %v1334_v38 = vmax.f32 %v1302_v12, 0.0  ;;  %v4277_v0 = vld [vmem:[#allocation21_spill] sm:$0xff] }
 0x455   :  { %v2487_v14 = vpop.f32.mrf.mxu0  ;;  %v4278_v1 = vmax.f32 %v4277_v0, 0.0  ;;  %v4291_v0 = vld [vmem:[#allocation28_spill] sm:$0xff] }
 0x456   :  { %v1234_v16 = vmul.f32 %v2486_v8, %v3771_v58  ;;  %v1303_v26 = vadd.f32 %v1271_v5, %v4268_v62 }
 0x457   :  { %v2488_v42 = vpop.f32.mrf.mxu0 }
 0x458   :  { %v1272_v2 = vadd.f32 %v3776_v61, %v1234_v16  ;;  %v2489_v32 = vadd.f32 %v2488_v42, %v2487_v14  ;;  %v1335_v28 = vmax.f32 %v1303_v26, 0.0 }
 0x459   :  { %v2490_v37 = vpop.f32.mrf.mxu0 }
 0x45a   :  { %v1235_v20 = vmul.f32 %v2489_v32, %v3771_v58  ;;  %v1363_v36 = vpack.c.bf16 %v1335_v28, %v1334_v38  ;;  %v1304_v43 = vadd.f32 %v1272_v2, %v4270_v39  ;;  %v4284_v39 = vmax.f32 %v4283_v7, 0.0 }
 0x45b   :  { %v2491_v33 = vpop.f32.mrf.mxu0 }
 0x45c   :  { %v1273_v21 = vadd.f32 %v3776_v61, %v1235_v20  ;;  %v2492_v35 = vadd.f32 %v2491_v33, %v2490_v37  ;;  %2868 = vmatmul.mubr.bf16.gmra.mxu1 %v1363_v36  ;;  %v1336_v56 = vmax.f32 %v1304_v43, 0.0  ;;  %v4281_v20 = vld [vmem:[#allocation23_spill] sm:$0xff] }
 0x45d   :  { %v2493_v63 = vpop.f32.mrf.mxu0  ;;  %v4282_v36 = vmax.f32 %v4281_v20, 0.0  ;;  %v4295_v20 = vld [vmem:[#allocation30_spill] sm:$0xff] }
 0x45e   :  { %v1236_v25 = vmul.f32 %v2492_v35, %v3771_v58  ;;  %v1305_v19 = vadd.f32 %v1273_v21, %v4272_v29 }
 0x45f   :  { %v2494_v31 = vpop.f32.mrf.mxu0 }
 0x460   :  { %v1274_v34 = vadd.f32 %v3776_v61, %v1236_v25  ;;  %v2495_v24 = vadd.f32 %v2494_v31, %v2493_v63  ;;  %v1337_v6 = vmax.f32 %v1305_v19, 0.0 }
 0x461   :  { %v2496_v18 = vpop.f32.mrf.mxu0 }
 0x462   :  { %v1237_v23 = vmul.f32 %v2495_v24, %v3771_v58  ;;  %v1364_v17 = vpack.c.bf16 %v1337_v6, %v1336_v56  ;;  %v1306_v11 = vadd.f32 %v1274_v34, %v4274_v13  ;;  %v4288_v13 = vmax.f32 %v4287_v15, 0.0 }
 0x463   :  { %v2497_v22 = vpop.f32.mrf.mxu0 }
 0x464   :  { %v1275_v30 = vadd.f32 %v3776_v61, %v1237_v23  ;;  %v2498_v27 = vadd.f32 %v2497_v22, %v2496_v18  ;;  %2871 = vmatprep.mubr.bf16.mxu1 %v1364_v17  ;;  %v1338_v51 = vmax.f32 %v1306_v11, 0.0  ;;  %v4285_v23 = vld [vmem:[#allocation25_spill] sm:$0xff] }
 0x465   :  { %v2499_v41 = vpop.f32.mrf.mxu0  ;;  %v4286_v17 = vmax.f32 %v4285_v23, 0.0  ;;  %v4299_v23 = vld [vmem:[#allocation32_spill] sm:$0xff] }
 0x466   :  { %v1238_v44 = vmul.f32 %v2498_v27, %v3771_v58  ;;  %v1307_v47 = vadd.f32 %v1275_v30, %v4276_v46 }
 0x467   :  { %v2500_v48 = vpop.f32.mrf.mxu0 }
 0x468   :  { %v1276_v49 = vadd.f32 %v3776_v61, %v1238_v44  ;;  %v2501_v50 = vadd.f32 %v2500_v48, %v2499_v41  ;;  %v1339_v52 = vmax.f32 %v1307_v47, 0.0 }
 0x469   :  { %v2502_v53 = vpop.f32.mrf.mxu0 }
 0x46a   :  { %v1239_v54 = vmul.f32 %v2501_v50, %v3771_v58  ;;  %v1365_v55 = vpack.c.bf16 %v1339_v52, %v1338_v51  ;;  %v1308_v4 = vadd.f32 %v1276_v49, %v4278_v1  ;;  %v4292_v1 = vmax.f32 %v4291_v0, 0.0 }
 0x46b   :  { %v2503_v57 = vpop.f32.mrf.mxu0 }
 0x46c   :  { %v1277_v59 = vadd.f32 %v3776_v61, %v1239_v54  ;;  %v2504_v60 = vadd.f32 %v2503_v57, %v2502_v53  ;;  %2872 = vmatmul.mubr.bf16.gmra.mxu1 %v1365_v55  ;;  %v1340_v62 = vmax.f32 %v1308_v4, 0.0  ;;  %v4289_v54 = vld [vmem:[#allocation27_spill] sm:$0xff] }
 0x46d   :  { %v2505_v5 = vpop.f32.mrf.mxu0  ;;  %v4290_v55 = vmax.f32 %v4289_v54, 0.0  ;;  %v4303_v54 = vld [vmem:[#allocation34_spill] sm:$0xff] }
 0x46e   :  { %v1240_v8 = vmul.f32 %v2504_v60, %v3771_v58  ;;  %v1309_v12 = vadd.f32 %v1277_v59, %v4280_v10 }
 0x46f   :  { %v2506_v14 = vpop.f32.mrf.mxu0 }
 0x470   :  { %v1278_v16 = vadd.f32 %v3776_v61, %v1240_v8  ;;  %v2507_v40 = vadd.f32 %v2506_v14, %v2505_v5  ;;  %v1341_v26 = vmax.f32 %v1309_v12, 0.0 }
 0x471   :  { %v2508_v42 = vpop.f32.mrf.mxu0 }
 0x472   :  { %v1241_v2 = vmul.f32 %v2507_v40, %v3771_v58  ;;  %v1366_v32 = vpack.c.bf16 %v1341_v26, %v1340_v62  ;;  %v1310_v33 = vadd.f32 %v1278_v16, %v4282_v36  ;;  %v4296_v36 = vmax.f32 %v4295_v20, 0.0 }
 0x473   :  { %v2509_v38 = vpop.f32.mrf.mxu0 }
 0x474   :  { %v1279_v28 = vadd.f32 %v3776_v61, %v1241_v2  ;;  %v2510_v37 = vadd.f32 %v2509_v38, %v2508_v42  ;;  %2875 = vmatprep.mubr.bf16.mxu1 %v1366_v32  ;;  %v1342_v29 = vmax.f32 %v1310_v33, 0.0  ;;  %v4293_v2 = vld [vmem:[#allocation29_spill] sm:$0xff] }
 0x475   :  { %v2511_v21 = vpop.f32.mrf.mxu0  ;;  %v4294_v32 = vmax.f32 %v4293_v2, 0.0  ;;  %v4307_v2 = vld [vmem:[#allocation36_spill] sm:$0xff] }
 0x476   :  { %v1242_v35 = vmul.f32 %v2510_v37, %v3771_v58  ;;  %v1311_v43 = vadd.f32 %v1279_v28, %v4284_v39 }
 0x477   :  { %v2512_v63 = vpop.f32.mrf.mxu0 }
 0x478   :  { %v1280_v25 = vadd.f32 %v3776_v61, %v1242_v35  ;;  %v2513_v3 = vadd.f32 %v2512_v63, %v2511_v21  ;;  %v1343_v19 = vmax.f32 %v1311_v43, 0.0 }
 0x479   :  { %v2514_v31 = vpop.f32.mrf.mxu0 }
 0x47a   :  { %v1243_v34 = vmul.f32 %v2513_v3, %v3771_v58  ;;  %v1367_v24 = vpack.c.bf16 %v1343_v19, %v1342_v29  ;;  %v1312_v22 = vadd.f32 %v1280_v25, %v4286_v17  ;;  %v4300_v17 = vmax.f32 %v4299_v23, 0.0 }
 0x47b   :  { %v2515_v56 = vpop.f32.mrf.mxu0 }
 0x47c   :  { %v1281_v6 = vadd.f32 %v3776_v61, %v1243_v34  ;;  %v2516_v18 = vadd.f32 %v2515_v56, %v2514_v31  ;;  %2876 = vmatmul.mubr.bf16.gmra.mxu1 %v1367_v24  ;;  %v1344_v46 = vmax.f32 %v1312_v22, 0.0  ;;  %v4297_v34 = vld [vmem:[#allocation31_spill] sm:$0xff] }
 0x47d   :  { %v2517_v30 = vpop.f32.mrf.mxu0  ;;  %v4298_v24 = vmax.f32 %v4297_v34, 0.0  ;;  %v4311_v34 = vld [vmem:[#allocation38_spill] sm:$0xff] }
 0x47e   :  { %v1244_v27 = vmul.f32 %v2516_v18, %v3771_v58  ;;  %v1313_v11 = vadd.f32 %v1281_v6, %v4288_v13 }
 0x47f   :  { %v2518_v41 = vpop.f32.mrf.mxu0 }
 0x480   :  { %v1282_v44 = vadd.f32 %v3776_v61, %v1244_v27  ;;  %v2519_v45 = vadd.f32 %v2518_v41, %v2517_v30  ;;  %v1345_v47 = vmax.f32 %v1313_v11, 0.0 }
 0x481   :  { %v2520_v48 = vpop.f32.mrf.mxu0 }
 0x482   :  { %v1245_v49 = vmul.f32 %v2519_v45, %v3771_v58  ;;  %v1368_v50 = vpack.c.bf16 %v1345_v47, %v1344_v46  ;;  %v1314_v57 = vadd.f32 %v1282_v44, %v4290_v55  ;;  %v4304_v55 = vmax.f32 %v4303_v54, 0.0 }
 0x483   :  { %v2521_v51 = vpop.f32.mrf.mxu0 }
 0x484   :  { %v1283_v52 = vadd.f32 %v3776_v61, %v1245_v49  ;;  %v2522_v53 = vadd.f32 %v2521_v51, %v2520_v48  ;;  %2879 = vmatprep.mubr.bf16.mxu1 %v1368_v50  ;;  %v1346_v10 = vmax.f32 %v1314_v57, 0.0  ;;  %v4301_v49 = vld [vmem:[#allocation33_spill] sm:$0xff] }
 0x485   :  { %v2523_v59 = vpop.f32.mrf.mxu0  ;;  %v4302_v50 = vmax.f32 %v4301_v49, 0.0 }
 0x486   :  { %v1246_v60 = vmul.f32 %v2522_v53, %v3771_v58  ;;  %v1315_v4 = vadd.f32 %v1283_v52, %v4292_v1 }
 0x487   :  { %v2524_v5 = vpop.f32.mrf.mxu0 }
 0x488   :  { %v1284_v8 = vadd.f32 %v3776_v61, %v1246_v60  ;;  %v2525_v9 = vadd.f32 %v2524_v5, %v2523_v59  ;;  %v1347_v12 = vmax.f32 %v1315_v4, 0.0 }
 0x489   :  { %v2526_v14 = vpop.f32.mrf.mxu0 }
 0x48a   :  { %v1247_v16 = vmul.f32 %v2525_v9, %v3771_v58  ;;  %v1369_v40 = vpack.c.bf16 %v1347_v12, %v1346_v10  ;;  %v1316_v38 = vadd.f32 %v1284_v8, %v4294_v32  ;;  %v4308_v32 = vmax.f32 %v4307_v2, 0.0 }
 0x48b   :  { %v2527_v62 = vpop.f32.mrf.mxu0 }
 0x48c   :  { %v1285_v26 = vadd.f32 %v3776_v61, %v1247_v16  ;;  %v2528_v42 = vadd.f32 %v2527_v62, %v2526_v14  ;;  %2880 = vmatmul.mubr.bf16.gmra.mxu1 %v1369_v40  ;;  %v1348_v39 = vmax.f32 %v1316_v38, 0.0  ;;  %v4305_v16 = vld [vmem:[#allocation35_spill] sm:$0xff] }
 0x48d   :  { %v2529_v28 = vpop.f32.mrf.mxu0  ;;  %v4306_v40 = vmax.f32 %v4305_v16, 0.0 }
 0x48e   :  { %v1248_v37 = vmul.f32 %v2528_v42, %v3771_v58  ;;  %v1317_v33 = vadd.f32 %v1285_v26, %v4296_v36 }
 0x48f   :  { %v2530_v21 = vpop.f32.mrf.mxu0 }
 0x490   :  { %v1286_v35 = vadd.f32 %v3776_v61, %v1248_v37  ;;  %v2531_v7 = vadd.f32 %v2530_v21, %v2529_v28  ;;  %v1349_v43 = vmax.f32 %v1317_v33, 0.0 }
 0x491   :  { %v2532_v63 = vpop.f32.mrf.mxu0 }
 0x492   :  { %v1249_v25 = vmul.f32 %v2531_v7, %v3771_v58  ;;  %v1370_v3 = vpack.c.bf16 %v1349_v43, %v1348_v39  ;;  %v1318_v56 = vadd.f32 %v1286_v35, %v4298_v24  ;;  %v4312_v24 = vmax.f32 %v4311_v34, 0.0 }
 0x493   :  { %v2533_v29 = vpop.f32.mrf.mxu0 }
 0x494   :  { %v1287_v19 = vadd.f32 %v3776_v61, %v1249_v25  ;;  %v2534_v31 = vadd.f32 %v2533_v29, %v2532_v63  ;;  %2883 = vmatprep.mubr.bf16.mxu1 %v1370_v3  ;;  %v1350_v13 = vmax.f32 %v1318_v56, 0.0  ;;  %v4309_v25 = vld [vmem:[#allocation37_spill] sm:$0xff] }
 0x495   :  { %v2535_v6 = vpop.f32.mrf.mxu0  ;;  %v4310_v3 = vmax.f32 %v4309_v25, 0.0 }
 0x496   :  { %v1250_v18 = vmul.f32 %v2534_v31, %v3771_v58  ;;  %v1319_v22 = vadd.f32 %v1287_v19, %v4300_v17 }
 0x497   :  { %v2536_v30 = vpop.f32.mrf.mxu0 }
 0x498   :  { %v1288_v27 = vadd.f32 %v3776_v61, %v1250_v18  ;;  %v2537_v15 = vadd.f32 %v2536_v30, %v2535_v6  ;;  %v1351_v11 = vmax.f32 %v1319_v22, 0.0 }
 0x499   :  { %v2538_v41 = vpop.f32.mrf.mxu0 }
 0x49a   :  { %v1251_v44 = vmul.f32 %v2537_v15, %v3771_v58  ;;  %v1371_v45 = vpack.c.bf16 %v1351_v11, %v1350_v13  ;;  %v1320_v51 = vadd.f32 %v1288_v27, %v4302_v50  ;;  %v4313_v13 = vld [vmem:[#allocation39_spill] sm:$0xff] }
 0x49b   :  { %v2539_v46 = vpop.f32.mrf.mxu0  ;;  %v4314_v11 = vmax.f32 %v4313_v13, 0.0  ;;  %v3023_v50 = vld [vmem:[%s4123_s0 + $0x4] ss:$8 sps:$4 sm:$0xff]   ;;  %v3028_v13 = vld [vmem:[%s4123_s0 + $0x20] ss:$8 sps:$4 sm:$0xff]  }
 0x49c   :  { %v1289_v47 = vadd.f32 %v3776_v61, %v1251_v44  ;;  %v2540_v48 = vadd.f32 %v2539_v46, %v2538_v41  ;;  %2884 = vmatmul.mubr.bf16.gmra.mxu1 %v1371_v45  ;;  %v1352_v1 = vmax.f32 %v1320_v51, 0.0  ;;  %v4315_v44 = vld [vmem:[#allocation40_spill] sm:$0xff] }
 0x49d   :  { %v2541_v52 = vpop.f32.mrf.mxu0  ;;  %v4316_v45 = vmax.f32 %v4315_v44, 0.0  ;;  %v3031_v44 = vld [vmem:[%s4123_s0 + $0x44] ss:$8 sps:$4 sm:$0xff]  }
 0x49e   :  { %v1252_v53 = vmul.f32 %v2540_v48, %v3771_v58  ;;  %v1321_v57 = vadd.f32 %v1289_v47, %v4304_v55 }
 0x49f   :  { %v2542_v59 = vpop.f32.mrf.mxu0 }
 0x4a0   :  { %v1290_v60 = vadd.f32 %v3776_v61, %v1252_v53  ;;  %v2543_v0 = vadd.f32 %v2542_v59, %v2541_v52  ;;  %v1353_v4 = vmax.f32 %v1321_v57, 0.0 }
 0x4a1   :  { %v2544_v5 = vpop.f32.mrf.mxu0 }
 0x4a2   :  { %v1253_v8 = vmul.f32 %v2543_v0, %v3771_v58  ;;  %v1372_v9 = vpack.c.bf16 %v1353_v4, %v1352_v1  ;;  %v1322_v62 = vadd.f32 %v1290_v60, %v4306_v40 }
 0x4a3   :  { %v2545_v10 = vpop.f32.mrf.mxu0 }
 0x4a4   :  { %v1291_v12 = vadd.f32 %v3776_v61, %v1253_v8  ;;  %v2546_v14 = vadd.f32 %v2545_v10, %v2544_v5  ;;  %2887 = vmatprep.mubr.bf16.mxu1 %v1372_v9  ;;  %v1354_v36 = vmax.f32 %v1322_v62, 0.0 }
 0x4a5   :  { %v2547_v26 = vpop.f32.mrf.mxu0 }
 0x4a6   :  { %v1254_v42 = vmul.f32 %v2546_v14, %v3771_v58  ;;  %v1323_v38 = vadd.f32 %v1291_v12, %v4308_v32 }
 0x4a7   :  { %v2548_v28 = vpop.f32.mrf.mxu0 }
 0x4a8   :  { %v1292_v37 = vadd.f32 %v3776_v61, %v1254_v42  ;;  %v2549_v20 = vadd.f32 %v2548_v28, %v2547_v26  ;;  %v1355_v33 = vmax.f32 %v1323_v38, 0.0 }
 0x4a9   :  { %v2550_v21 = vpop.f32.mrf.mxu0 }
 0x4aa   :  { %v1255_v35 = vmul.f32 %v2549_v20, %v3771_v58  ;;  %v1373_v7 = vpack.c.bf16 %v1355_v33, %v1354_v36  ;;  %v1324_v29 = vadd.f32 %v1292_v37, %v4310_v3 }
 0x4ab   :  { %v2551_v39 = vpop.f32.mrf.mxu0 }
 0x4ac   :  { %v1293_v43 = vadd.f32 %v3776_v61, %v1255_v35  ;;  %v2552_v63 = vadd.f32 %v2551_v39, %v2550_v21  ;;  %2888 = vmatmul.mubr.bf16.gmra.mxu1 %v1373_v7  ;;  %v1356_v17 = vmax.f32 %v1324_v29, 0.0 }
 0x4ad   :  { %v2553_v19 = vpop.f32.mrf.mxu0 }
 0x4ae   :  { %v1256_v31 = vmul.f32 %v2552_v63, %v3771_v58  ;;  %v1325_v56 = vadd.f32 %v1293_v43, %v4312_v24 }
 0x4af   :  { %v2554_v6 = vpop.f32.mrf.mxu0 }
 0x4b0   :  { %v1294_v18 = vadd.f32 %v3776_v61, %v1256_v31  ;;  %v2555_v23 = vadd.f32 %v2554_v6, %v2553_v19  ;;  %v1357_v22 = vmax.f32 %v1325_v56, 0.0 }
 0x4b2   :  { %v1257_v30 = vmul.f32 %v2555_v23, %v3771_v58  ;;  %v1374_v27 = vpack.c.bf16 %v1357_v22, %v1356_v17  ;;  %v1326_v41 = vadd.f32 %v1294_v18, %v4314_v11  ;;  %v3015_v23 = vld [vmem:[%s4130_s11 + $0x38] sm:$0xff]   ;;  %v3016_v17 = vld [vmem:[%s4130_s11 + $0x30] sm:$0xff]   ;;  %v3024_v22 = vld [vmem:[%s4123_s0] ss:$8 sps:$4 sm:$0xff]  }
 0x4b3   :  { %2895 = vmatprep.subr.bf16.mxu0 %v3015_v23  ;;  %v3029_v11 = vld [vmem:[%s4123_s0 + $0x34] ss:$8 sps:$4 sm:$0xff]  }
 0x4b4   :  { %v1295_v15 = vadd.f32 %v3776_v61, %v1257_v30  ;;  %2891 = vmatprep.mubr.bf16.mxu1 %v1374_v27  ;;  %v1358_v47 = vmax.f32 %v1326_v41, 0.0  ;;  %2896 = vmatpush3.bf16.msra.mxu0 %v3015_v23  ;;  %v3025_v30 = vld [vmem:[%s4123_s0 + $0x14] ss:$8 sps:$4 sm:$0xff]   ;;  %v3026_v27 = vld [vmem:[%s4123_s0 + $0x10] ss:$8 sps:$4 sm:$0xff]  }
 0x4b5   :  { %2897 = vmatprep.subr.bf16.mxu0 %v3016_v17  ;;  %v3030_v41 = vld [vmem:[%s4123_s0 + $0x30] ss:$8 sps:$4 sm:$0xff]  }
 0x4b6   :  { %v1327_v46 = vadd.f32 %v1295_v15, %v4316_v45  ;;  %v3027_v15 = vld [vmem:[%s4123_s0 + $0x24] ss:$8 sps:$4 sm:$0xff]   ;;  %v3032_v45 = vld [vmem:[%s4123_s0 + $0x40] ss:$8 sps:$4 sm:$0xff]  }
 0x4b8   :  { %v1359_v48 = vmax.f32 %v1327_v46, 0.0  ;;  %2898 = vmatpush3.bf16.msra.mxu0 %v3016_v17  ;;  %v3033_v46 = vld [vmem:[%s4123_s0 + $0x54] ss:$8 sps:$4 sm:$0xff]  }
 0x4ba   :  { %v1375_v49 = vpack.c.bf16 %v1359_v48, %v1358_v47  ;;  %v3034_v47 = vld [vmem:[%s4123_s0 + $0x50] ss:$8 sps:$4 sm:$0xff]   ;;  %v3035_v48 = vld [vmem:[%s4123_s0 + $0x64] ss:$8 sps:$4 sm:$0xff]  }
 0x4bc   :  { %2892 = vmatmul.mubr.bf16.gmra.mxu1 %v1375_v49  ;;  %v3036_v49 = vld [vmem:[%s4123_s0 + $0x60] ss:$8 sps:$4 sm:$0xff]  }
 0x4bd   :  { %1651 = vmatprep.mubr.bf16.mxu1 %v3023_v50  ;;  %v3037_v50 = vld [vmem:[%s4123_s0 + $0x74] ss:$8 sps:$4 sm:$0xff]  }
 0x50c   :  { %v2865_v58 = vpop.f32.mrf.mxu1 }
 0x50e   :  { %v3909_v51 = vpop.f32.mrf.mxu1 }
 0x510   :  { %v2866_v61 = vpop.f32.mrf.mxu1 }
 0x511   :  { %v1604_v52 = vpack.c.bf16 %v2866_v61, %v2865_v58  ;;  %v3038_v58 = vld [vmem:[%s4123_s0 + $0x70] ss:$8 sps:$4 sm:$0xff]   ;;  %v3017_v61 = vld [vmem:[%s4130_s11 + $0x28] sm:$0xff]  }
 0x512   :  { %v3911_v53 = vpop.f32.mrf.mxu1  ;;  %2899 = vmatprep.subr.bf16.mxu0 %v3017_v61 }
 0x513   :  { %v1603_v54 = vpack.c.bf16 %v3911_v53, %v3909_v51  ;;  %v3039_v51 = vld [vmem:[%s4123_s0 + $0x84] ss:$8 sps:$4 sm:$0xff]   ;;  %v3041_v53 = vld [vmem:[%s4123_s0 + $0x94] ss:$8 sps:$4 sm:$0xff]   ;;  %2900 = vmatpush3.bf16.msra.mxu0 %v3017_v61 }
 0x51c   :  { %v2869_v55 = vpop.f32.mrf.mxu1 }
 0x51e   :  { %v1490_v57 = vpop.f32.mrf.mxu1 }
 0x520   :  { %v2870_v59 = vpop.f32.mrf.mxu1 }
 0x521   :  { %v1606_v60 = vpack.c.bf16 %v2870_v59, %v2869_v55  ;;  %v3019_v55 = vld [vmem:[%s4130_s11 + $0x18] sm:$0xff]   ;;  %v3043_v59 = vld [vmem:[%s4123_s0 + $0xa4] ss:$8 sps:$4 sm:$0xff]  }
 0x522   :  { %v1493_v0 = vpop.f32.mrf.mxu1 }
 0x523   :  { %v1605_v1 = vpack.c.bf16 %v1493_v0, %v1490_v57  ;;  %v3042_v57 = vld [vmem:[%s4123_s0 + $0x90] ss:$8 sps:$4 sm:$0xff]   ;;  %v3021_v0 = vld [vmem:[%s4130_s11 + $0x8] sm:$0xff]  }
 0x52c   :  { %v2873_v4 = vpop.f32.mrf.mxu1 }
 0x52e   :  { %v1506_v5 = vpop.f32.mrf.mxu1 }
 0x530   :  { %v2874_v8 = vpop.f32.mrf.mxu1 }
 0x531   :  { %v1608_v19 = vpack.c.bf16 %v2874_v8, %v2873_v4  ;;  %v3045_v4 = vld [vmem:[%s4123_s0 + $0xb4] ss:$8 sps:$4 sm:$0xff]   ;;  %v3046_v8 = vld [vmem:[%s4123_s0 + $0xb0] ss:$8 sps:$4 sm:$0xff]  }
 0x532   :  { %v1509_v9 = vpop.f32.mrf.mxu1 }
 0x533   :  { %v1607_v34 = vpack.c.bf16 %v1509_v9, %v1506_v5  ;;  %v3022_v5 = vld [vmem:[%s4130_s11] sm:$0xff]  }
 0x534   :  { %v3047_v9 = vld [vmem:[%s4123_s0 + $0xc4] ss:$8 sps:$4 sm:$0xff]  }
 0x53c   :  { %v2877_v10 = vpop.f32.mrf.mxu1 }
 0x53e   :  { %v1522_v12 = vpop.f32.mrf.mxu1 }
 0x540   :  { %v2878_v14 = vpop.f32.mrf.mxu1 }
 0x541   :  { %v1610_v43 = vpack.c.bf16 %v2878_v14, %v2877_v10  ;;  %v3048_v10 = vld [vmem:[%s4123_s0 + $0xc0] ss:$8 sps:$4 sm:$0xff]   ;;  %v3050_v14 = vld [vmem:[%s4123_s0 + $0xd0] ss:$8 sps:$4 sm:$0xff]  }
 0x542   :  { %v1525_v16 = vpop.f32.mrf.mxu1 }
 0x543   :  { %v1609_v3 = vpack.c.bf16 %v1525_v16, %v1522_v12  ;;  %v3049_v12 = vld [vmem:[%s4123_s0 + $0xd4] ss:$8 sps:$4 sm:$0xff]   ;;  %v3051_v16 = vld [vmem:[%s4123_s0 + $0xe4] ss:$8 sps:$4 sm:$0xff]  }
 0x54c   :  { %v2881_v40 = vpop.f32.mrf.mxu1 }
 0x54e   :  { %v1538_v62 = vpop.f32.mrf.mxu1 }
 0x550   :  { %v2882_v26 = vpop.f32.mrf.mxu1 }
 0x551   :  { %v1612_v6 = vpack.c.bf16 %v2882_v26, %v2881_v40  ;;  %v3052_v40 = vld [vmem:[%s4123_s0 + $0xe0] ss:$8 sps:$4 sm:$0xff]   ;;  %v3054_v26 = vld [vmem:[%s4123_s0 + $0xf0] ss:$8 sps:$4 sm:$0xff]  }
 0x552   :  { %v1541_v42 = vpop.f32.mrf.mxu1 }
 0x553   :  { %v1611_v18 = vpack.c.bf16 %v1541_v42, %v1538_v62  ;;  %v3053_v62 = vld [vmem:[%s4123_s0 + $0xf4] ss:$8 sps:$4 sm:$0xff]  }
 0x55c   :  { %v2885_v2 = vpop.f32.mrf.mxu1 }
 0x55e   :  { %v1554_v32 = vpop.f32.mrf.mxu1 }
 0x560   :  { %v2886_v38 = vpop.f32.mrf.mxu1 }
 0x561   :  { %v1614_v24 = vpack.c.bf16 %v2886_v38, %v2885_v2  ;;  %v4035_v2 = vld [vmem:[%s4131_s9] ss:$0 sm:$0xff] }
 0x562   :  { %v1557_v28 = vpop.f32.mrf.mxu1 }
 0x563   :  { %v1613_v56 = vpack.c.bf16 %v1557_v28, %v1554_v32 }
 0x56c   :  { %v2889_v37 = vpop.f32.mrf.mxu1 }
 0x56e   :  { %v1570_v20 = vpop.f32.mrf.mxu1 }
 0x570   :  { %v2890_v36 = vpop.f32.mrf.mxu1 }
 0x571   :  { %v1616_v29 = vpack.c.bf16 %v2890_v36, %v2889_v37 }
 0x572   :  { %v1573_v33 = vpop.f32.mrf.mxu1 }
 0x573   :  { %v1615_v31 = vpack.c.bf16 %v1573_v33, %v1570_v20  ;;  %v4041_v20 = vld [vmem:[%s4132_s10] ss:$0 sm:$0xff] }
 0x57c   :  { %v2893_v21 = vpop.f32.mrf.mxu1 }
 0x57e   :  { %v1586_v35 = vpop.f32.mrf.mxu1 }
 0x580   :  { %v2894_v7 = vpop.f32.mrf.mxu1 }
 0x581   :  { %v1618_v39 = vpack.c.bf16 %v2894_v7, %v2893_v21 }
 0x582   :  { %v1589_v63 = vpop.f32.mrf.mxu1 }
 0x583   :  { %v1617_v25 = vpack.c.bf16 %v1589_v63, %v1586_v35  ;;  %2580 = vmatprep.subr.bf16.mxu1 %v1618_v39 }
 0x584   :  { %2581 = vmatpush3.bf16.msra.mxu1 %v1610_v43 }
 0x585   :  { %2582 = vmatprep.subr.bf16.mxu1 %v1617_v25 }
 0x588   :  { %2583 = vmatpush3.bf16.msra.mxu1 %v1609_v3 }
 0x589   :  { %2584 = vmatprep.subr.bf16.mxu1 %v1616_v29 }
 0x58c   :  { %2585 = vmatpush3.bf16.msra.mxu1 %v1608_v19 }
 0x58d   :  { %2586 = vmatprep.subr.bf16.mxu1 %v1615_v31 }
 0x590   :  { %2587 = vmatpush3.bf16.msra.mxu1 %v1607_v34 }
 0x591   :  { %2588 = vmatprep.subr.bf16.mxu1 %v1614_v24 }
 0x594   :  { %2589 = vmatpush3.bf16.msra.mxu1 %v1606_v60  ;;  %v3020_v60 = vld [vmem:[%s4130_s11 + $0x10] sm:$0xff]  }
 0x595   :  { %2590 = vmatprep.subr.bf16.mxu1 %v1613_v56 }
 0x598   :  { %2591 = vmatpush3.bf16.msra.mxu1 %v1605_v1  ;;  %v3044_v1 = vld [vmem:[%s4123_s0 + $0xa0] ss:$8 sps:$4 sm:$0xff]  }
 0x599   :  { %2592 = vmatprep.subr.bf16.mxu1 %v1612_v6 }
 0x59c   :  { %2593 = vmatpush3.bf16.msra.mxu1 %v1604_v52  ;;  %v3040_v52 = vld [vmem:[%s4123_s0 + $0x80] ss:$8 sps:$4 sm:$0xff]  }
 0x59d   :  { %2594 = vmatprep.subr.bf16.mxu1 %v1611_v18 }
 0x5a0   :  { %2595 = vmatpush3.bf16.msra.mxu1 %v1603_v54  ;;  %v3018_v54 = vld [vmem:[%s4130_s11 + $0x20] sm:$0xff]  }
 0x5a1   :  { %2901 = vmatprep.subr.bf16.mxu0 %v3018_v54 }
 0x5a2   :  { %2902 = vmatpush3.bf16.msra.mxu0 %v3018_v54 }
 0x5a3   :  { %1652 = vmatmul.mubr.bf16.vlgmr.msra.gmra.mxu1 %v3024_v22  ;;  %2903 = vmatprep.subr.bf16.mxu0 %v3019_v55 }
 0x5a4   :  { %1659 = vmatprep.mubr.bf16.mxu1 %v3025_v30 }
 0x5a6   :  { %2904 = vmatpush3.bf16.msra.mxu0 %v3019_v55 }
 0x5a7   :  { %2905 = vmatprep.subr.bf16.mxu0 %v3020_v60 }
 0x5aa   :  { %2906 = vmatpush3.bf16.msra.mxu0 %v3020_v60 }
 0x5ab   :  { %1660 = vmatmul.mubr.bf16.gmra.mxu1 %v3026_v27  ;;  %2907 = vmatprep.subr.bf16.mxu0 %v3021_v0 }
 0x5ac   :  { %1667 = vmatprep.mubr.bf16.mxu1 %v3027_v15 }
 0x5ae   :  { %2908 = vmatpush3.bf16.msra.mxu0 %v3021_v0 }
 0x5af   :  { %2909 = vmatprep.subr.bf16.mxu0 %v3022_v5 }
 0x5b2   :  { %2910 = vmatpush3.bf16.msra.mxu0 %v3022_v5 }
 0x5b3   :  { %1668 = vmatmul.mubr.bf16.gmra.mxu1 %v3028_v13 }
 0x5b4   :  { %1675 = vmatprep.mubr.bf16.mxu1 %v3029_v11 }
 0x5bb   :  { %1676 = vmatmul.mubr.bf16.gmra.mxu1 %v3030_v41 }
 0x5bc   :  { %1683 = vmatprep.mubr.bf16.mxu1 %v3031_v44 }
 0x5c3   :  { %1684 = vmatmul.mubr.bf16.gmra.mxu1 %v3032_v45 }
 0x5c4   :  { %1691 = vmatprep.mubr.bf16.mxu1 %v3033_v46 }
 0x5cb   :  { %1692 = vmatmul.mubr.bf16.gmra.mxu1 %v3034_v47 }
 0x5cc   :  { %1699 = vmatprep.mubr.bf16.mxu1 %v3035_v48 }
 0x5d3   :  { %1700 = vmatmul.mubr.bf16.gmra.mxu1 %v3036_v49 }
 0x5d4   :  { %1707 = vmatprep.mubr.bf16.mxu1 %v3037_v50 }
 0x5db   :  { %1708 = vmatmul.mubr.bf16.gmra.mxu1 %v3038_v58 }
 0x5dc   :  { %1715 = vmatprep.mubr.bf16.mxu1 %v3039_v51 }
 0x5e3   :  { %1716 = vmatmul.mubr.bf16.gmra.mxu1 %v3040_v52 }
 0x5e4   :  { %1723 = vmatprep.mubr.bf16.mxu1 %v3041_v53 }
 0x5eb   :  { %1724 = vmatmul.mubr.bf16.gmra.mxu1 %v3042_v57 }
 0x5ec   :  { %1731 = vmatprep.mubr.bf16.mxu1 %v3043_v59 }
 0x5f3   :  { %1732 = vmatmul.mubr.bf16.gmra.mxu1 %v3044_v1 }
 0x5f4   :  { %1739 = vmatprep.mubr.bf16.mxu1 %v3045_v4 }
 0x5fb   :  { %1740 = vmatmul.mubr.bf16.gmra.mxu1 %v3046_v8 }
 0x5fc   :  { %1747 = vmatprep.mubr.bf16.mxu1 %v3047_v9 }
 0x603   :  { %1748 = vmatmul.mubr.bf16.gmra.mxu1 %v3048_v10 }
 0x604   :  { %1755 = vmatprep.mubr.bf16.mxu1 %v3049_v12 }
 0x60b   :  { %1756 = vmatmul.mubr.bf16.gmra.mxu1 %v3050_v14 }
 0x60c   :  { %1763 = vmatprep.mubr.bf16.mxu1 %v3051_v16 }
 0x613   :  { %1764 = vmatmul.mubr.bf16.gmra.mxu1 %v3052_v40 }
 0x614   :  { %1771 = vmatprep.mubr.bf16.mxu1 %v3053_v62 }
 0x61b   :  { %1772 = vmatmul.mubr.bf16.gmra.mxu1 %v3054_v26 }
 0x663   :  { %v2596_v42 = vpop.f32.mrf.mxu1 }
 0x665   :  { %v2597_v32 = vpop.f32.mrf.mxu1 }
 0x666   :  { %v2598_v38 = vadd.f32 %v2597_v32, %v2596_v42 }
 0x667   :  { %v2599_v28 = vpop.f32.mrf.mxu1 }
 0x668   :  { %v1786_v37 = vmul.f32 %v2598_v38, %v4035_v2 }
 0x669   :  { %v2600_v36 = vpop.f32.mrf.mxu1 }
 0x66a   :  { %v2601_v33 = vadd.f32 %v2600_v36, %v2599_v28  ;;  %v1824_v35 = vadd.f32 %v4041_v20, %v1786_v37 }
 0x66b   :  { %v2602_v21 = vpop.f32.mrf.mxu1 }
 0x66c   :  { %v1787_v7 = vmul.f32 %v2601_v33, %v4035_v2  ;;  %v1856_v3 = vmax.f32 %v1824_v35, 0.0 }
 0x66d   :  { %v2603_v39 = vpop.f32.mrf.mxu1 }
 0x66e   :  { %v1825_v43 = vadd.f32 %v4041_v20, %v1787_v7  ;;  %v2604_v63 = vadd.f32 %v2603_v39, %v2602_v21 }
 0x66f   :  { %v2605_v25 = vpop.f32.mrf.mxu1 }
 0x670   :  { %v1857_v29 = vmax.f32 %v1825_v43, 0.0  ;;  %v1788_v19 = vmul.f32 %v2604_v63, %v4035_v2 }
 0x671   :  { %v2606_v31 = vpop.f32.mrf.mxu1 }
 0x672   :  { %v2607_v34 = vadd.f32 %v2606_v31, %v2605_v25  ;;  %v1888_v24 = vpack.c.bf16 %v1857_v29, %v1856_v3  ;;  %v1826_v6 = vadd.f32 %v4041_v20, %v1788_v19 }
 0x673   :  { %v2608_v56 = vpop.f32.mrf.mxu1 }
 0x674   :  { %v1789_v18 = vmul.f32 %v2607_v34, %v4035_v2  ;;  %2911 = vmatprep.mubr.bf16.mxu0 %v1888_v24  ;;  %v1858_v27 = vmax.f32 %v1826_v6, 0.0 }
 0x675   :  { %v2609_v23 = vpop.f32.mrf.mxu1 }
 0x676   :  { %v1827_v17 = vadd.f32 %v4041_v20, %v1789_v18  ;;  %v2610_v22 = vadd.f32 %v2609_v23, %v2608_v56 }
 0x677   :  { %v2611_v30 = vpop.f32.mrf.mxu1 }
 0x678   :  { %v1859_v15 = vmax.f32 %v1827_v17, 0.0  ;;  %v1790_v13 = vmul.f32 %v2610_v22, %v4035_v2 }
 0x679   :  { %v2612_v11 = vpop.f32.mrf.mxu1 }
 0x67a   :  { %v1889_v41 = vpack.c.bf16 %v1859_v15, %v1858_v27  ;;  %v2613_v44 = vadd.f32 %v2612_v11, %v2611_v30  ;;  %v1828_v46 = vadd.f32 %v4041_v20, %v1790_v13 }
 0x67b   :  { %v2614_v45 = vpop.f32.mrf.mxu1 }
 0x67c   :  { %v1791_v47 = vmul.f32 %v2613_v44, %v4035_v2  ;;  %2912 = vmatmul.mubr.bf16.vlgmr.msra.gmra.mxu0 %v1889_v41  ;;  %v1860_v51 = vmax.f32 %v1828_v46, 0.0 }
 0x67d   :  { %v2615_v48 = vpop.f32.mrf.mxu1 }
 0x67e   :  { %v1829_v49 = vadd.f32 %v4041_v20, %v1791_v47  ;;  %v2616_v50 = vadd.f32 %v2615_v48, %v2614_v45 }
 0x67f   :  { %v2617_v58 = vpop.f32.mrf.mxu1 }
 0x680   :  { %v1861_v61 = vmax.f32 %v1829_v49, 0.0  ;;  %v1792_v52 = vmul.f32 %v2616_v50, %v4035_v2 }
 0x681   :  { %v2618_v53 = vpop.f32.mrf.mxu1 }
 0x682   :  { %v2619_v54 = vadd.f32 %v2618_v53, %v2617_v58  ;;  %v1890_v55 = vpack.c.bf16 %v1861_v61, %v1860_v51  ;;  %v1830_v59 = vadd.f32 %v4041_v20, %v1792_v52 }
 0x683   :  { %v2620_v57 = vpop.f32.mrf.mxu1 }
 0x684   :  { %v1793_v60 = vmul.f32 %v2619_v54, %v4035_v2  ;;  %2915 = vmatprep.mubr.bf16.mxu0 %v1890_v55  ;;  %v1862_v8 = vmax.f32 %v1830_v59, 0.0 }
 0x685   :  { %v2621_v0 = vpop.f32.mrf.mxu1 }
 0x686   :  { %v1831_v1 = vadd.f32 %v4041_v20, %v1793_v60  ;;  %v2622_v4 = vadd.f32 %v2621_v0, %v2620_v57 }
 0x687   :  { %v2623_v5 = vpop.f32.mrf.mxu1 }
 0x688   :  { %v1863_v9 = vmax.f32 %v1831_v1, 0.0  ;;  %v1794_v10 = vmul.f32 %v2622_v4, %v4035_v2 }
 0x689   :  { %v2624_v12 = vpop.f32.mrf.mxu1 }
 0x68a   :  { %v1891_v14 = vpack.c.bf16 %v1863_v9, %v1862_v8  ;;  %v2625_v16 = vadd.f32 %v2624_v12, %v2623_v5  ;;  %v1832_v62 = vadd.f32 %v4041_v20, %v1794_v10 }
 0x68b   :  { %v2626_v40 = vpop.f32.mrf.mxu1 }
 0x68c   :  { %v1795_v26 = vmul.f32 %v2625_v16, %v4035_v2  ;;  %2916 = vmatmul.mubr.bf16.gmra.mxu0 %v1891_v14  ;;  %v1864_v37 = vmax.f32 %v1832_v62, 0.0 }
 0x68d   :  { %v2627_v42 = vpop.f32.mrf.mxu1 }
 0x68e   :  { %v1833_v32 = vadd.f32 %v4041_v20, %v1795_v26  ;;  %v2628_v38 = vadd.f32 %v2627_v42, %v2626_v40 }
 0x68f   :  { %v2629_v28 = vpop.f32.mrf.mxu1 }
 0x690   :  { %v1865_v36 = vmax.f32 %v1833_v32, 0.0  ;;  %v1796_v33 = vmul.f32 %v2628_v38, %v4035_v2 }
 0x691   :  { %v2630_v21 = vpop.f32.mrf.mxu1 }
 0x692   :  { %v2631_v35 = vadd.f32 %v2630_v21, %v2629_v28  ;;  %v1892_v7 = vpack.c.bf16 %v1865_v36, %v1864_v37  ;;  %v1834_v43 = vadd.f32 %v4041_v20, %v1796_v33 }
 0x693   :  { %v2632_v39 = vpop.f32.mrf.mxu1 }
 0x694   :  { %v1797_v63 = vmul.f32 %v2631_v35, %v4035_v2  ;;  %2919 = vmatprep.mubr.bf16.mxu0 %v1892_v7  ;;  %v1866_v31 = vmax.f32 %v1834_v43, 0.0 }
 0x695   :  { %v2633_v25 = vpop.f32.mrf.mxu1 }
 0x696   :  { %v1835_v3 = vadd.f32 %v4041_v20, %v1797_v63  ;;  %v2634_v29 = vadd.f32 %v2633_v25, %v2632_v39 }
 0x697   :  { %v2635_v19 = vpop.f32.mrf.mxu1 }
 0x698   :  { %v1867_v34 = vmax.f32 %v1835_v3, 0.0  ;;  %v1798_v24 = vmul.f32 %v2634_v29, %v4035_v2 }
 0x699   :  { %v2636_v56 = vpop.f32.mrf.mxu1 }
 0x69a   :  { %v1893_v6 = vpack.c.bf16 %v1867_v34, %v1866_v31  ;;  %v2637_v18 = vadd.f32 %v2636_v56, %v2635_v19  ;;  %v1836_v17 = vadd.f32 %v4041_v20, %v1798_v24 }
 0x69b   :  { %v2638_v23 = vpop.f32.mrf.mxu1 }
 0x69c   :  { %v1799_v22 = vmul.f32 %v2637_v18, %v4035_v2  ;;  %2920 = vmatmul.mubr.bf16.gmra.mxu0 %v1893_v6  ;;  %v1868_v11 = vmax.f32 %v1836_v17, 0.0 }
 0x69d   :  { %v2639_v30 = vpop.f32.mrf.mxu1 }
 0x69e   :  { %v1837_v27 = vadd.f32 %v4041_v20, %v1799_v22  ;;  %v2640_v15 = vadd.f32 %v2639_v30, %v2638_v23 }
 0x69f   :  { %v2641_v13 = vpop.f32.mrf.mxu1 }
 0x6a0   :  { %v1869_v41 = vmax.f32 %v1837_v27, 0.0  ;;  %v1800_v44 = vmul.f32 %v2640_v15, %v4035_v2 }
 0x6a1   :  { %v2642_v45 = vpop.f32.mrf.mxu1 }
 0x6a2   :  { %v2643_v46 = vadd.f32 %v2642_v45, %v2641_v13  ;;  %v1894_v47 = vpack.c.bf16 %v1869_v41, %v1868_v11  ;;  %v1838_v49 = vadd.f32 %v4041_v20, %v1800_v44 }
 0x6a3   :  { %v2644_v48 = vpop.f32.mrf.mxu1 }
 0x6a4   :  { %v1801_v50 = vmul.f32 %v2643_v46, %v4035_v2  ;;  %2923 = vmatprep.mubr.bf16.mxu0 %v1894_v47  ;;  %v1870_v53 = vmax.f32 %v1838_v49, 0.0 }
 0x6a5   :  { %v2645_v58 = vpop.f32.mrf.mxu1 }
 0x6a6   :  { %v1839_v51 = vadd.f32 %v4041_v20, %v1801_v50  ;;  %v2646_v61 = vadd.f32 %v2645_v58, %v2644_v48 }
 0x6a7   :  { %v2647_v52 = vpop.f32.mrf.mxu1 }
 0x6a8   :  { %v1871_v54 = vmax.f32 %v1839_v51, 0.0  ;;  %v1802_v55 = vmul.f32 %v2646_v61, %v4035_v2 }
 0x6a9   :  { %v2648_v57 = vpop.f32.mrf.mxu1 }
 0x6aa   :  { %v1895_v59 = vpack.c.bf16 %v1871_v54, %v1870_v53  ;;  %v2649_v60 = vadd.f32 %v2648_v57, %v2647_v52  ;;  %v1840_v1 = vadd.f32 %v4041_v20, %v1802_v55 }
 0x6ab   :  { %v2650_v0 = vpop.f32.mrf.mxu1 }
 0x6ac   :  { %v1803_v4 = vmul.f32 %v2649_v60, %v4035_v2  ;;  %2924 = vmatmul.mubr.bf16.gmra.mxu0 %v1895_v59  ;;  %v1872_v12 = vmax.f32 %v1840_v1, 0.0 }
 0x6ad   :  { %v2651_v5 = vpop.f32.mrf.mxu1 }
 0x6ae   :  { %v1841_v8 = vadd.f32 %v4041_v20, %v1803_v4  ;;  %v2652_v9 = vadd.f32 %v2651_v5, %v2650_v0 }
 0x6af   :  { %v2653_v10 = vpop.f32.mrf.mxu1 }
 0x6b0   :  { %v1873_v14 = vmax.f32 %v1841_v8, 0.0  ;;  %v1804_v16 = vmul.f32 %v2652_v9, %v4035_v2 }
 0x6b1   :  { %v2654_v40 = vpop.f32.mrf.mxu1 }
 0x6b2   :  { %v2655_v62 = vadd.f32 %v2654_v40, %v2653_v10  ;;  %v1896_v26 = vpack.c.bf16 %v1873_v14, %v1872_v12  ;;  %v1842_v32 = vadd.f32 %v4041_v20, %v1804_v16 }
 0x6b3   :  { %v2656_v42 = vpop.f32.mrf.mxu1 }
 0x6b4   :  { %v1805_v38 = vmul.f32 %v2655_v62, %v4035_v2  ;;  %2927 = vmatprep.mubr.bf16.mxu0 %v1896_v26  ;;  %v1874_v21 = vmax.f32 %v1842_v32, 0.0 }
 0x6b5   :  { %v2657_v28 = vpop.f32.mrf.mxu1 }
 0x6b6   :  { %v1843_v37 = vadd.f32 %v4041_v20, %v1805_v38  ;;  %v2658_v36 = vadd.f32 %v2657_v28, %v2656_v42 }
 0x6b7   :  { %v2659_v33 = vpop.f32.mrf.mxu1 }
 0x6b8   :  { %v1875_v35 = vmax.f32 %v1843_v37, 0.0  ;;  %v1806_v7 = vmul.f32 %v2658_v36, %v4035_v2 }
 0x6b9   :  { %v2660_v39 = vpop.f32.mrf.mxu1 }
 0x6ba   :  { %v1897_v43 = vpack.c.bf16 %v1875_v35, %v1874_v21  ;;  %v2661_v63 = vadd.f32 %v2660_v39, %v2659_v33  ;;  %v1844_v3 = vadd.f32 %v4041_v20, %v1806_v7 }
 0x6bb   :  { %v2662_v25 = vpop.f32.mrf.mxu1 }
 0x6bc   :  { %v1807_v29 = vmul.f32 %v2661_v63, %v4035_v2  ;;  %2928 = vmatmul.mubr.bf16.gmra.mxu0 %v1897_v43  ;;  %v1876_v56 = vmax.f32 %v1844_v3, 0.0 }
 0x6bd   :  { %v2663_v19 = vpop.f32.mrf.mxu1 }
 0x6be   :  { %v1845_v31 = vadd.f32 %v4041_v20, %v1807_v29  ;;  %v2664_v34 = vadd.f32 %v2663_v19, %v2662_v25 }
 0x6bf   :  { %v2665_v24 = vpop.f32.mrf.mxu1 }
 0x6c0   :  { %v1877_v6 = vmax.f32 %v1845_v31, 0.0  ;;  %v1808_v18 = vmul.f32 %v2664_v34, %v4035_v2 }
 0x6c1   :  { %v2666_v23 = vpop.f32.mrf.mxu1 }
 0x6c2   :  { %v2667_v17 = vadd.f32 %v2666_v23, %v2665_v24  ;;  %v1898_v22 = vpack.c.bf16 %v1877_v6, %v1876_v56  ;;  %v1846_v27 = vadd.f32 %v4041_v20, %v1808_v18 }
 0x6c3   :  { %v2668_v30 = vpop.f32.mrf.mxu1 }
 0x6c4   :  { %v1809_v15 = vmul.f32 %v2667_v17, %v4035_v2  ;;  %2931 = vmatprep.mubr.bf16.mxu0 %v1898_v22  ;;  %v1878_v45 = vmax.f32 %v1846_v27, 0.0  ;;  %v2130_v17 = vld [vmem:[%s4133_s13 + $0x8] sm:$0xff] }
 0x6c5   :  { %v2669_v13 = vpop.f32.mrf.mxu1 }
 0x6c6   :  { %v1847_v11 = vadd.f32 %v4041_v20, %v1809_v15  ;;  %v2670_v41 = vadd.f32 %v2669_v13, %v2668_v30 }
 0x6c7   :  { %v2671_v44 = vpop.f32.mrf.mxu1 }
 0x6c8   :  { %v1879_v46 = vmax.f32 %v1847_v11, 0.0  ;;  %v1810_v47 = vmul.f32 %v2670_v41, %v4035_v2 }
 0x6c9   :  { %v2672_v48 = vpop.f32.mrf.mxu1 }
 0x6ca   :  { %v1899_v49 = vpack.c.bf16 %v1879_v46, %v1878_v45  ;;  %v2673_v50 = vadd.f32 %v2672_v48, %v2671_v44  ;;  %v1848_v51 = vadd.f32 %v4041_v20, %v1810_v47 }
 0x6cb   :  { %v2674_v58 = vpop.f32.mrf.mxu1 }
 0x6cc   :  { %v1811_v61 = vmul.f32 %v2673_v50, %v4035_v2  ;;  %2932 = vmatmul.mubr.bf16.gmra.mxu0 %v1899_v49  ;;  %v1880_v57 = vmax.f32 %v1848_v51, 0.0 }
 0x6cd   :  { %v2675_v52 = vpop.f32.mrf.mxu1 }
 0x6ce   :  { %v1849_v53 = vadd.f32 %v4041_v20, %v1811_v61  ;;  %v2676_v54 = vadd.f32 %v2675_v52, %v2674_v58 }
 0x6cf   :  { %v2677_v55 = vpop.f32.mrf.mxu1 }
 0x6d0   :  { %v1881_v59 = vmax.f32 %v1849_v53, 0.0  ;;  %v1812_v60 = vmul.f32 %v2676_v54, %v4035_v2 }
 0x6d1   :  { %v2678_v0 = vpop.f32.mrf.mxu1 }
 0x6d2   :  { %v2679_v1 = vadd.f32 %v2678_v0, %v2677_v55  ;;  %v1900_v4 = vpack.c.bf16 %v1881_v59, %v1880_v57  ;;  %v1850_v8 = vadd.f32 %v4041_v20, %v1812_v60 }
 0x6d3   :  { %v2680_v5 = vpop.f32.mrf.mxu1 }
 0x6d4   :  { %v1813_v9 = vmul.f32 %v2679_v1, %v4035_v2  ;;  %2935 = vmatprep.mubr.bf16.mxu0 %v1900_v4  ;;  %v1882_v40 = vmax.f32 %v1850_v8, 0.0  ;;  %v2129_v8 = vld [vmem:[%s4133_s13] sm:$0xff] }
 0x6d5   :  { %v2681_v10 = vpop.f32.mrf.mxu1 }
 0x6d6   :  { %v1851_v12 = vadd.f32 %v4041_v20, %v1813_v9  ;;  %v2682_v14 = vadd.f32 %v2681_v10, %v2680_v5  ;;  %v2283_v10 = vld [vmem:[%s4134_s12] ss:$0 sm:$0xff] }
 0x6d7   :  { %v2683_v16 = vpop.f32.mrf.mxu1 }
 0x6d8   :  { %v1883_v62 = vmax.f32 %v1851_v12, 0.0  ;;  %v1814_v26 = vmul.f32 %v2682_v14, %v4035_v2 }
 0x6d9   :  { %v2684_v42 = vpop.f32.mrf.mxu1 }
 0x6da   :  { %v1901_v32 = vpack.c.bf16 %v1883_v62, %v1882_v40  ;;  %v2685_v38 = vadd.f32 %v2684_v42, %v2683_v16  ;;  %v1852_v37 = vadd.f32 %v4041_v20, %v1814_v26 }
 0x6db   :  { %v2686_v28 = vpop.f32.mrf.mxu1 }
 0x6dc   :  { %v1815_v36 = vmul.f32 %v2685_v38, %v4035_v2  ;;  %2936 = vmatmul.mubr.bf16.gmra.mxu0 %v1901_v32  ;;  %v1884_v39 = vmax.f32 %v1852_v37, 0.0 }
 0x6dd   :  { %v2687_v33 = vpop.f32.mrf.mxu1 }
 0x6de   :  { %v1853_v21 = vadd.f32 %v4041_v20, %v1815_v36  ;;  %v2688_v35 = vadd.f32 %v2687_v33, %v2686_v28 }
 0x6df   :  { %v2689_v7 = vpop.f32.mrf.mxu1 }
 0x6e0   :  { %v1885_v43 = vmax.f32 %v1853_v21, 0.0  ;;  %v1816_v63 = vmul.f32 %v2688_v35, %v4035_v2 }
 0x6e1   :  { %v2690_v25 = vpop.f32.mrf.mxu1 }
 0x6e2   :  { %v2691_v3 = vadd.f32 %v2690_v25, %v2689_v7  ;;  %v1902_v29 = vpack.c.bf16 %v1885_v43, %v1884_v39  ;;  %v1854_v19 = vadd.f32 %v4041_v20, %v1816_v63 }
 0x6e4   :  { %v1817_v31 = vmul.f32 %v2691_v3, %v4035_v2  ;;  %2939 = vmatprep.mubr.bf16.mxu0 %v1902_v29  ;;  %v1886_v24 = vmax.f32 %v1854_v19, 0.0 }
 0x6e6   :  { %v1855_v34 = vadd.f32 %v4041_v20, %v1817_v31 }
 0x6e8   :  { %v1887_v56 = vmax.f32 %v1855_v34, 0.0 }
 0x6ea   :  { %v1903_v6 = vpack.c.bf16 %v1887_v56, %v1886_v24 }
 0x6ec   :  { %2940 = vmatmul.mubr.bf16.gmra.mxu0 %v1903_v6 }
 0x6ed   :  { %2202 = vmatprep.mubr.f32.mxu0 %v2130_v17 }
 0x73c   :  { %v2913_v18 = vpop.f32.mrf.mxu0 }
 0x73e   :  { %v4106_v23 = vpop.f32.mrf.mxu0 }
 0x740   :  { %v2914_v22 = vpop.f32.mrf.mxu0 }
 0x742   :  { %v2005_v30 = vpop.f32.mrf.mxu0 }
 0x74c   :  { %v2917_v27 = vpop.f32.mrf.mxu0 }
 0x74e   :  { %v2018_v15 = vpop.f32.mrf.mxu0 }
 0x750   :  { %v2918_v2 = vpop.f32.mrf.mxu0 }
 0x752   :  { %v2021_v13 = vpop.f32.mrf.mxu0 }
 0x75c   :  { %v2921_v11 = vpop.f32.mrf.mxu0 }
 0x75e   :  { %v2034_v20 = vpop.f32.mrf.mxu0 }
 0x760   :  { %v2922_v41 = vpop.f32.mrf.mxu0 }
 0x762   :  { %v2037_v44 = vpop.f32.mrf.mxu0 }
 0x76c   :  { %v2925_v45 = vpop.f32.mrf.mxu0 }
 0x76e   :  { %v2050_v46 = vpop.f32.mrf.mxu0 }
 0x770   :  { %v2926_v47 = vpop.f32.mrf.mxu0 }
 0x772   :  { %v2053_v48 = vpop.f32.mrf.mxu0 }
 0x77c   :  { %v2929_v49 = vpop.f32.mrf.mxu0 }
 0x77e   :  { %v2066_v50 = vpop.f32.mrf.mxu0 }
 0x780   :  { %v2930_v58 = vpop.f32.mrf.mxu0 }
 0x782   :  { %v2069_v51 = vpop.f32.mrf.mxu0 }
 0x78c   :  { %v2933_v61 = vpop.f32.mrf.mxu0 }
 0x78e   :  { %v2082_v52 = vpop.f32.mrf.mxu0 }
 0x790   :  { %v2934_v53 = vpop.f32.mrf.mxu0 }
 0x792   :  { %v2085_v54 = vpop.f32.mrf.mxu0 }
 0x79c   :  { %v2937_v55 = vpop.f32.mrf.mxu0 }
 0x79e   :  { %v2098_v57 = vpop.f32.mrf.mxu0 }
 0x7a0   :  { %v2938_v59 = vpop.f32.mrf.mxu0 }
 0x7a2   :  { %v2101_v60 = vpop.f32.mrf.mxu0 }
 0x7ac   :  { %v2941_v0 = vpop.f32.mrf.mxu0 }
 0x7ae   :  { %v2114_v1 = vpop.f32.mrf.mxu0 }
 0x7b0   :  { %v2942_v4 = vpop.f32.mrf.mxu0 }
 0x7b1   :  { %2716 = vmatprep.subr.mxu0 %v2942_v4 }
 0x7b2   :  { %2717 = vmatpush3.msra.mxu0 %v2926_v47  ;;  %v2117_v5 = vpop.f32.mrf.mxu0 }
 0x7b3   :  { %2718 = vmatprep.subr.mxu0 %v2941_v0 }
 0x7b4   :  { %2719 = vmatpush3.msra.mxu0 %v2925_v45 }
 0x7b5   :  { %2720 = vmatprep.subr.mxu0 %v2117_v5 }
 0x7b6   :  { %2721 = vmatpush3.msra.mxu0 %v2053_v48 }
 0x7b7   :  { %2722 = vmatprep.subr.mxu0 %v2114_v1 }
 0x7b8   :  { %2723 = vmatpush3.msra.mxu0 %v2050_v46 }
 0x7b9   :  { %2724 = vmatprep.subr.mxu0 %v2938_v59 }
 0x7ba   :  { %2725 = vmatpush3.msra.mxu0 %v2922_v41 }
 0x7bb   :  { %2726 = vmatprep.subr.mxu0 %v2937_v55 }
 0x7bc   :  { %2727 = vmatpush3.msra.mxu0 %v2921_v11 }
 0x7bd   :  { %2728 = vmatprep.subr.mxu0 %v2101_v60 }
 0x7be   :  { %2729 = vmatpush3.msra.mxu0 %v2037_v44 }
 0x7bf   :  { %2730 = vmatprep.subr.mxu0 %v2098_v57 }
 0x7c0   :  { %2731 = vmatpush3.msra.mxu0 %v2034_v20 }
 0x7c1   :  { %2732 = vmatprep.subr.mxu0 %v2934_v53 }
 0x7c2   :  { %2733 = vmatpush3.msra.mxu0 %v2918_v2 }
 0x7c3   :  { %2734 = vmatprep.subr.mxu0 %v2933_v61 }
 0x7c4   :  { %2735 = vmatpush3.msra.mxu0 %v2917_v27 }
 0x7c5   :  { %2736 = vmatprep.subr.mxu0 %v2085_v54 }
 0x7c6   :  { %2737 = vmatpush3.msra.mxu0 %v2021_v13 }
 0x7c7   :  { %2738 = vmatprep.subr.mxu0 %v2082_v52 }
 0x7c8   :  { %2739 = vmatpush3.msra.mxu0 %v2018_v15 }
 0x7c9   :  { %2740 = vmatprep.subr.mxu0 %v2930_v58 }
 0x7ca   :  { %2741 = vmatpush3.msra.mxu0 %v2914_v22 }
 0x7cb   :  { %2742 = vmatprep.subr.mxu0 %v2929_v49 }
 0x7cc   :  { %2743 = vmatpush3.msra.mxu0 %v2913_v18 }
 0x7cd   :  { %2744 = vmatprep.subr.mxu0 %v2069_v51 }
 0x7ce   :  { %2745 = vmatpush3.msra.mxu0 %v2005_v30 }
 0x7cf   :  { %2746 = vmatprep.subr.mxu0 %v2066_v50 }
 0x7d0   :  { %2747 = vmatpush3.msra.mxu0 %v4106_v23 }
 0x7d1   :  { %2203 = vmatmul.mubr.f32.vlgmr.msra.gmra.mxu0 %v2129_v8 }
 0x891   :  { %v2748_v9 = vpop.f32.mrf.mxu0 }
 0x893   :  { %v2749_v12 = vpop.f32.mrf.mxu0 }
 0x894   :  { %v2750_v14 = vadd.f32 %v2749_v12, %v2748_v9 }
 0x896   :  { %v2205_v16 = vadd.f32 %v2750_v14, %v2283_v10 }
 0x898   :  { %2208 = vst [vmem:[%s4135_s14] sm:$0xff] %v2205_v16 }

</bundles_post_ra>
